<compile_context>
chip_gen: v5e
topology: v5e:2x2
jax: 0.10.0
libtpu: 0.0.40
codegen_flags: <defaults>
</compile_context>

<pallas_src>
import functools
import math

import numpy as np
import jax
import jax.numpy as jnp
from jax.experimental import pallas as pl
from jax.experimental.pallas import tpu as pltpu


PAD_ROWS = 16     # zero rows before/after the packed slab (>= conv halo and a
                  # multiple of both the f32 (8) and bf16 (16) sublane tiles)
LANES = 128       # every layer's channel width is padded to one vreg width


# ------------------------------- kernel -------------------------------
def _fused_heads_kernel(feat_ref, mask_ref, scale_ref, w_ref, b_ref,
                        out_ref, scr_ref, *, Mp, num_layers, num_classes):
    """Single grid step: all FPN levels / batches packed into one row slab.

    feat_ref : (PAD+Mp+PAD, 128) f32  time-major rows, channels in lanes
    mask_ref : (Mp, 1) f32            per-row validity mask
    scale_ref: (Mp, 1) f32            per-row (== per-level) reg Scale()
    w_ref    : (num_layers*3, 128, 128) bf16  per-tap fused cls||reg weights
    b_ref    : (num_layers, 1, 128) f32       fused biases
    out_ref  : (Mp, 128) f32          cls logits lanes [0,nc) | reg offsets next
    scr_ref  : (PAD+Mp+PAD, 128) f32  hidden-activation slab
    """
    # rows outside [PAD_ROWS, PAD_ROWS+Mp) stay zero -> conv zero padding for
    # every hidden layer; zeroed exactly once.
    scr_ref[...] = jnp.zeros_like(scr_ref)
    # hoist the (Mp,1)->(Mp,128) mask lane broadcast out of the layer loop
    mb = jnp.broadcast_to(mask_ref[...], (Mp, LANES))

    src = feat_ref
    for i in range(num_layers):
        # conv1d (k=3) == 3 MXU matmuls over row-shifted views of the slab;
        # the +-1-row reads are cheap shifted loads, every store below is a
        # full-width, tile-aligned vst.
        xu = src[pl.ds(PAD_ROWS - 1, Mp), :].astype(jnp.bfloat16)   # x[t-1]
        xc = src[pl.ds(PAD_ROWS, Mp), :].astype(jnp.bfloat16)       # x[t]
        xd = src[pl.ds(PAD_ROWS + 1, Mp), :].astype(jnp.bfloat16)   # x[t+1]
        y = jnp.dot(xu, w_ref[3 * i + 0], preferred_element_type=jnp.float32)
        y = y + jnp.dot(xc, w_ref[3 * i + 1], preferred_element_type=jnp.float32)
        y = y + jnp.dot(xd, w_ref[3 * i + 2], preferred_element_type=jnp.float32)
        y = (y + b_ref[i]) * mb                     # MaskedConv1D: (conv+b)*mask
        if i + 1 < num_layers:
            scr_ref[pl.ds(PAD_ROWS, Mp), :] = jnp.maximum(y, 0.0)   # ReLU
            src = scr_ref
        else:
            # fused final layer: cls logits stay linear, reg = relu(Scale()*x)
            y_reg = jnp.maximum(y * scale_ref[...], 0.0)
            lane = jax.lax.broadcasted_iota(jnp.int32, (1, LANES), 1)
            out_ref[...] = jnp.where(lane < num_classes, y, y_reg)


# --------------------------- parameter handling ---------------------------
def init_params(key, input_dim, head_dim, num_classes, num_layers, ksize,
                fpn_levels, prior_prob=0.01, class_aware=False):
    def conv_w(k, cout, cin):
        return 0.02 * jax.random.normal(k, (cout, cin, ksize), jnp.float32)

    keys = jax.random.split(key, 2 * (num_layers - 1) + 2)
    ki = 0
    params = {'cls': {'head': []}, 'reg': {'head': []}}
    # CCNet_ClsHead
    for idx in range(num_layers - 1):
        cin = input_dim if idx == 0 else head_dim
        params['cls']['head'].append(
            (conv_w(keys[ki], head_dim, cin), jnp.zeros((head_dim,), jnp.float32)))
        ki += 1
    cls_bias = jnp.full((num_classes,),
                        -math.log((1.0 - prior_prob) / prior_prob), jnp.float32)
    params['cls']['final'] = (conv_w(keys[ki], num_classes, head_dim), cls_bias)
    ki += 1
    # CCNet_RegHead
    for idx in range(num_layers - 1):
        cin = input_dim if idx == 0 else head_dim
        params['reg']['head'].append(
            (conv_w(keys[ki], head_dim, cin), jnp.zeros((head_dim,), jnp.float32)))
        ki += 1
    out_off = 2 * num_classes if class_aware else 2
    params['reg']['final'] = (conv_w(keys[ki], out_off, head_dim),
                              jnp.zeros((out_off,), jnp.float32))
    params['reg']['scales'] = jnp.ones((fpn_levels,), jnp.float32)  # Scale() init
    return params


def pack_head_params(params, num_classes, class_aware):
    """One-time fusion of cls+reg conv weights into 128-lane padded, bf16,
    per-tap matmul form (cls half / reg half of the hidden lanes)."""
    cls_layers = params['cls']['head'] + [params['cls']['final']]
    reg_layers = params['reg']['head'] + [params['reg']['final']]
    num_layers = len(cls_layers)
    assert num_layers >= 2, "need at least one hidden conv layer"
    H, cin, K = cls_layers[0][0].shape
    assert K == 3, "kernel assumes head_kernel_size == 3"
    ro = 2 * num_classes if class_aware else 2
    assert cin <= LANES and 2 * H <= LANES and num_classes + ro <= LANES

    def kio(w):  # (Cout, Cin, K) -> (K, Cin, Cout)
        return jnp.transpose(w.astype(jnp.float32), (2, 1, 0))

    Ws, Bs = [], []
    for i in range(num_layers):
        (wc, bc), (wr, br) = cls_layers[i], reg_layers[i]
        last = (i == num_layers - 1)
        in_c = slice(0, cin) if i == 0 else slice(0, H)
        in_r = slice(0, cin) if i == 0 else slice(H, 2 * H)
        out_c = slice(0, num_classes) if last else slice(0, H)
        out_r = slice(num_classes, num_classes + ro) if last else slice(H, 2 * H)
        W = jnp.zeros((K, LANES, LANES), jnp.float32)
        W = W.at[:, in_c, out_c].set(kio(wc)).at[:, in_r, out_r].set(kio(wr))
        b = jnp.zeros((LANES,), jnp.float32).at[out_c].set(bc).at[out_r].set(br)
        Ws.append(W)
        Bs.append(b.reshape(1, LANES))
    W_all = jnp.concatenate(Ws, axis=0).astype(jnp.bfloat16)  # (num_layers*3,128,128)
    B_all = jnp.stack(Bs, axis=0)                              # (num_layers,1,128)
    return dict(W=W_all, b=B_all,
                scales=params['reg']['scales'].astype(jnp.float32),
                K=K, H=H, cin=cin, num_layers=num_layers,
                num_classes=num_classes, reg_out=ro, class_aware=class_aware)


# --------------------------- fused forward wrapper ---------------------------
def ccnet_heads_forward(gra_feature, masks, packed):
    """Post-backbone part of CCNet_CMCC_MTGC.forward() — one fused pallas_call."""
    L = len(gra_feature)
    B, cin, _ = gra_feature[0].shape
    assert cin == packed['cin']
    nc, ro = packed['num_classes'], packed['reg_out']
    T_list = [int(f.shape[-1]) for f in gra_feature]
    seg_rows = [B * (1 + t) for t in T_list]          # 1 zero gap row per (lvl, b)
    offs = np.concatenate([[0], np.cumsum(seg_rows)]).astype(np.int64)
    Mraw = int(offs[-1])
    Mp = ((Mraw + 15) // 16) * 16                     # aligned row count
    assert Mp % 8 == 0 and LANES == 128

    # Pack all (level, batch) segments raggedly into one lane-dense row slab.
    # The leading zero row of each segment is the conv's left zero padding; the
    # next segment's gap row / the slab's trailing zeros are its right padding.
    # NCT -> NTC happens exactly once per level, here.
    feat_rows, mask_rows = [], []
    for f, m, t in zip(gra_feature, masks, T_list):
        ntc = jnp.transpose(f.astype(jnp.float32), (0, 2, 1))        # (B, T, cin)
        ntc = jnp.pad(ntc, ((0, 0), (1, 0), (0, 0)))                 # gap row
        feat_rows.append(ntc.reshape(B * (1 + t), cin))
        mm = jnp.pad(m[:, 0, :].astype(jnp.float32), ((0, 0), (1, 0)))
        mask_rows.append(mm.reshape(B * (1 + t)))
    feat = jnp.concatenate(feat_rows, axis=0)                        # (Mraw, cin)
    feat = jnp.pad(feat, ((PAD_ROWS, PAD_ROWS + Mp - Mraw), (0, LANES - cin)))
    mask_v = jnp.pad(jnp.concatenate(mask_rows), (0, Mp - Mraw)).reshape(Mp, 1)
    lvl_of_row = np.zeros((Mp,), np.int32)
    for l in range(L):
        lvl_of_row[offs[l]:offs[l + 1]] = l
    scale_v = packed['scales'][jnp.asarray(lvl_of_row)].reshape(Mp, 1)

    num_layers = packed['num_layers']
    kernel = functools.partial(_fused_heads_kernel, Mp=Mp,
                               num_layers=num_layers, num_classes=nc)
    flops = 2 * num_layers * packed['K'] * Mp * LANES * LANES
    bytes_accessed = (4 * (int(feat.size) + int(mask_v.size) + int(scale_v.size)
                           + int(packed['b'].size) + Mp * LANES)
                      + 2 * int(packed['W'].size))

    out = pl.pallas_call(
        kernel,
        out_shape=jax.ShapeDtypeStruct((Mp, LANES), jnp.float32),
        grid=(1,),
        in_specs=[
            pl.BlockSpec((Mp + 2 * PAD_ROWS, LANES), lambda i: (0, 0)),  # features
            pl.BlockSpec((Mp, 1), lambda i: (0, 0)),                     # mask
            pl.BlockSpec((Mp, 1), lambda i: (0, 0)),                     # reg scale
            pl.BlockSpec(packed['W'].shape, lambda i: (0, 0, 0)),        # weights
            pl.BlockSpec(packed['b'].shape, lambda i: (0, 0, 0)),        # biases
        ],
        out_specs=pl.BlockSpec((Mp, LANES), lambda i: (0, 0)),
        scratch_shapes=[pltpu.VMEM((Mp + 2 * PAD_ROWS, LANES), jnp.float32)],
        compiler_params=pltpu.CompilerParams(dimension_semantics=("arbitrary",)),
        cost_estimate=pl.CostEstimate(flops=int(flops), transcendentals=0,
                                      bytes_accessed=int(bytes_accessed)),
    )(feat, mask_v, scale_v, packed['W'], packed['b'])

    # slice the lane-dense output slab back into per-level (B, T, C) outputs
    out_cls, out_off, fpn_masks = [], [], []
    for l in range(L):
        blk = out[int(offs[l]):int(offs[l + 1])]
        blk = blk.reshape(B, 1 + T_list[l], LANES)[:, 1:, :]
        out_cls.append(blk[..., :nc])
        off = blk[..., nc:nc + ro]
        if packed['class_aware']:
            off = off.reshape(B, T_list[l], nc, 2)
        out_off.append(off)
        fpn_masks.append(masks[l][:, 0, :])
    return out_cls, out_off, fpn_masks


# ---------------- pure-JAX reference for correctness check ----------------
def _ref_masked_conv1d(x, mask_f, w, b, scale=1.0, relu=False):
    pad = w.shape[-1] // 2
    out = jax.lax.conv_general_dilated(
        x, w, window_strides=(1,), padding=((pad, pad),),
        dimension_numbers=('NCH', 'OIH', 'NCH'))
    out = out + b[None, :, None]
    out = out * mask_f
    out = out * jnp.asarray(scale, jnp.float32)
    if relu:
        out = jnp.maximum(out, 0.0)
    return out


def ccnet_heads_forward_ref(gra_feature, masks, params, num_classes,
                            class_aware=False):
    out_cls_logits, out_offsets = [], []
    for l, (feat, mask) in enumerate(zip(gra_feature, masks)):
        mask_f = mask.astype(jnp.float32)
        cur = feat
        for (w, b) in params['cls']['head']:
            cur = _ref_masked_conv1d(cur, mask_f, w, b, relu=True)
        w, b = params['cls']['final']
        out_cls_logits.append(_ref_masked_conv1d(cur, mask_f, w, b, relu=False))
        cur = feat
        for (w, b) in params['reg']['head']:
            cur = _ref_masked_conv1d(cur, mask_f, w, b, relu=True)
        w, b = params['reg']['final']
        out_offsets.append(_ref_masked_conv1d(
            cur, mask_f, w, b, scale=params['reg']['scales'][l], relu=True))
    out_cls_logits = [jnp.transpose(x, (0, 2, 1)) for x in out_cls_logits]
    if class_aware:
        out_offsets = [jnp.transpose(x, (0, 2, 1)).reshape(
            x.shape[0], x.shape[2], num_classes, -1) for x in out_offsets]
    else:
        out_offsets = [jnp.transpose(x, (0, 2, 1)) for x in out_offsets]
    fpn_masks = [m[:, 0, :] for m in masks]
    return out_cls_logits, out_offsets, fpn_masks


if __name__ == "__main__":
    key = jax.random.PRNGKey(0)
    B = 2
    embd_dim = 32
    input_dim = 2 * embd_dim        # gra_feature channels = embd_dim * 2
    head_dim = 32
    num_classes = 4
    head_num_layers = 3
    head_kernel_size = 3
    scale_factor = 2
    backbone_arch_last = 2
    fpn_strides = [scale_factor ** i for i in range(backbone_arch_last + 1)]  # [1,2,4]
    max_seq_len = 64
    class_aware = False

    kf, kp = jax.random.split(key)
    feat_keys = jax.random.split(kf, len(fpn_strides))
    lens = jnp.array([max_seq_len, 48])
    gra_feature, masks = [], []
    for l, s in enumerate(fpn_strides):
        T_l = max_seq_len // s
        gra_feature.append(
            jax.random.normal(feat_keys[l], (B, input_dim, T_l), jnp.float32))
        m = (jnp.arange(T_l)[None, :] < (lens[:, None] // s))[:, None, :]
        masks.append(m)

    params = init_params(kp, input_dim, head_dim, num_classes, head_num_layers,
                         head_kernel_size, len(fpn_strides),
                         prior_prob=0.01, class_aware=class_aware)
    # exercise the per-level Scale() path with non-trivial values
    params['reg']['scales'] = jnp.array([1.0, 0.8, 1.25], jnp.float32)

    packed = pack_head_params(params, num_classes, class_aware)

    out_cls, out_off, fpn_masks = ccnet_heads_forward(gra_feature, masks, packed)
    jax.block_until_ready(out_cls + out_off + fpn_masks)

    ref_cls, ref_off, _ = ccnet_heads_forward_ref(
        gra_feature, masks, params, num_classes, class_aware)
    # bf16 MXU operands with f32 accumulation -> slightly loosened tolerance
    for got, ref in zip(out_cls + out_off, ref_cls + ref_off):
        assert got.shape == ref.shape, (got.shape, ref.shape)
        assert jnp.allclose(got, ref, atol=1e-2, rtol=1e-2), \
            "kernel/reference mismatch"

    print("KERNEL_OK")
</pallas_src>

<mosaic_0001>
module attributes {stable_mosaic.version = 11 : i64} {
  func.func @_fused_heads_kernel(%arg0: i32, %arg1: memref<272x128xf32, #tpu.memory_space<vmem>>, %arg2: memref<240x1xf32, #tpu.memory_space<vmem>>, %arg3: memref<240x1xf32, #tpu.memory_space<vmem>>, %arg4: memref<9x128x128xbf16, #tpu.memory_space<vmem>>, %arg5: memref<3x1x128xf32, #tpu.memory_space<vmem>>, %arg6: memref<240x128xf32, #tpu.memory_space<vmem>>, %arg7: memref<272x128xf32, #tpu.memory_space<vmem>>) attributes {dimension_semantics = [#tpu.dimension_semantics<arbitrary>], iteration_bounds = array<i64: 1>, scalar_prefetch = 0 : i64, scratch_operands = 1 : i64, tpu.core_type = #tpu.core_type<tc>, window_params = [{pipeline_mode = #tpu.pipeline_mode<synchronous>, transform_indices = @transform_0, window_bounds = array<i64: 272, 128>}, {pipeline_mode = #tpu.pipeline_mode<synchronous>, transform_indices = @transform_1, window_bounds = array<i64: 240, 1>}, {pipeline_mode = #tpu.pipeline_mode<synchronous>, transform_indices = @transform_2, window_bounds = array<i64: 240, 1>}, {pipeline_mode = #tpu.pipeline_mode<synchronous>, transform_indices = @transform_3, window_bounds = array<i64: 9, 128, 128>}, {pipeline_mode = #tpu.pipeline_mode<synchronous>, transform_indices = @transform_4, window_bounds = array<i64: 3, 1, 128>}, {pipeline_mode = #tpu.pipeline_mode<synchronous>, transform_indices = @transform_5, window_bounds = array<i64: 240, 128>}]} {
    %cst = arith.constant 0.000000e+00 : f32
    %0 = vector.broadcast %cst : f32 to vector<272x128xf32>
    %c0 = arith.constant 0 : index
    %c0_0 = arith.constant 0 : index
    %1 = vector.load %arg7[%c0, %c0_0] : memref<272x128xf32, #tpu.memory_space<vmem>>, vector<272x128xf32>
    tpu.vector_store %arg7[%c0, %c0_0], %0 {strides = array<i32>} : memref<272x128xf32, #tpu.memory_space<vmem>>, vector<272x128xf32>,
    %c0_1 = arith.constant 0 : index
    %c0_2 = arith.constant 0 : index
    %2 = vector.load %arg2[%c0_1, %c0_2] : memref<240x1xf32, #tpu.memory_space<vmem>>, vector<240x1xf32>
    %3 = vector.shape_cast %2 : vector<240x1xf32> to vector<240x1xf32>
    %4 = vector.broadcast %3 : vector<240x1xf32> to vector<240x128xf32>
    %c15 = arith.constant 15 : index
    %c0_3 = arith.constant 0 : index
    %5 = vector.load %arg1[%c15, %c0_3] : memref<272x128xf32, #tpu.memory_space<vmem>>, vector<240x128xf32>
    %6 = arith.truncf %5 : vector<240x128xf32> to vector<240x128xbf16>
    %c16 = arith.constant 16 : index
    %c0_4 = arith.constant 0 : index
    %7 = vector.load %arg1[%c16, %c0_4] : memref<272x128xf32, #tpu.memory_space<vmem>>, vector<240x128xf32>
    %8 = arith.truncf %7 : vector<240x128xf32> to vector<240x128xbf16>
    %c17 = arith.constant 17 : index
    %c0_5 = arith.constant 0 : index
    %9 = vector.load %arg1[%c17, %c0_5] : memref<272x128xf32, #tpu.memory_space<vmem>>, vector<240x128xf32>
    %10 = arith.truncf %9 : vector<240x128xf32> to vector<240x128xbf16>
    %c0_6 = arith.constant 0 : index
    %c0_7 = arith.constant 0 : index
    %c0_8 = arith.constant 0 : index
    %11 = vector.load %arg4[%c0_6, %c0_7, %c0_8] : memref<9x128x128xbf16, #tpu.memory_space<vmem>>, vector<1x128x128xbf16>
    %12 = vector.shape_cast %11 : vector<1x128x128xbf16> to vector<128x128xbf16>
    %cst_9 = arith.constant dense<0.000000e+00> : vector<240x128xf32>
    %13 = tpu.matmul %6, %12, %cst_9 {dimension_numbers = #tpu.dot_dimension_numbers<[1], [0], [0], [1], [0, 0, 1, 1], [], []>} : vector<240x128xbf16>, vector<128x128xbf16>, vector<240x128xf32> -> vector<240x128xf32>
    %c1 = arith.constant 1 : index
    %c0_10 = arith.constant 0 : index
    %c0_11 = arith.constant 0 : index
    %14 = vector.load %arg4[%c1, %c0_10, %c0_11] : memref<9x128x128xbf16, #tpu.memory_space<vmem>>, vector<1x128x128xbf16>
    %15 = vector.shape_cast %14 : vector<1x128x128xbf16> to vector<128x128xbf16>
    %cst_12 = arith.constant dense<0.000000e+00> : vector<240x128xf32>
    %16 = tpu.matmul %8, %15, %cst_12 {dimension_numbers = #tpu.dot_dimension_numbers<[1], [0], [0], [1], [0, 0, 1, 1], [], []>} : vector<240x128xbf16>, vector<128x128xbf16>, vector<240x128xf32> -> vector<240x128xf32>
    %17 = arith.addf %13, %16 : vector<240x128xf32>
    %c2 = arith.constant 2 : index
    %c0_13 = arith.constant 0 : index
    %c0_14 = arith.constant 0 : index
    %18 = vector.load %arg4[%c2, %c0_13, %c0_14] : memref<9x128x128xbf16, #tpu.memory_space<vmem>>, vector<1x128x128xbf16>
    %19 = vector.shape_cast %18 : vector<1x128x128xbf16> to vector<128x128xbf16>
    %cst_15 = arith.constant dense<0.000000e+00> : vector<240x128xf32>
    %20 = tpu.matmul %10, %19, %cst_15 {dimension_numbers = #tpu.dot_dimension_numbers<[1], [0], [0], [1], [0, 0, 1, 1], [], []>} : vector<240x128xbf16>, vector<128x128xbf16>, vector<240x128xf32> -> vector<240x128xf32>
    %21 = arith.addf %17, %20 : vector<240x128xf32>
    %c0_16 = arith.constant 0 : index
    %c0_17 = arith.constant 0 : index
    %c0_18 = arith.constant 0 : index
    %22 = vector.load %arg5[%c0_16, %c0_17, %c0_18] : memref<3x1x128xf32, #tpu.memory_space<vmem>>, vector<1x1x128xf32>
    %23 = vector.shape_cast %22 : vector<1x1x128xf32> to vector<1x128xf32>
    %24 = vector.broadcast %23 : vector<1x128xf32> to vector<240x128xf32>
    %25 = arith.addf %21, %24 : vector<240x128xf32>
    %26 = arith.mulf %25, %4 : vector<240x128xf32>
    %cst_19 = arith.constant 0.000000e+00 : f32
    %27 = vector.broadcast %cst_19 : f32 to vector<240x128xf32>
    %28 = arith.maximumf %26, %27 : vector<240x128xf32>
    %c16_20 = arith.constant 16 : index
    %c0_21 = arith.constant 0 : index
    %29 = vector.load %arg7[%c16_20, %c0_21] : memref<272x128xf32, #tpu.memory_space<vmem>>, vector<240x128xf32>
    tpu.vector_store %arg7[%c16_20, %c0_21], %28 {strides = array<i32>} : memref<272x128xf32, #tpu.memory_space<vmem>>, vector<240x128xf32>,
    %c15_22 = arith.constant 15 : index
    %c0_23 = arith.constant 0 : index
    %30 = vector.load %arg7[%c15_22, %c0_23] : memref<272x128xf32, #tpu.memory_space<vmem>>, vector<240x128xf32>
    %31 = arith.truncf %30 : vector<240x128xf32> to vector<240x128xbf16>
    %c16_24 = arith.constant 16 : index
    %c0_25 = arith.constant 0 : index
    %32 = vector.load %arg7[%c16_24, %c0_25] : memref<272x128xf32, #tpu.memory_space<vmem>>, vector<240x128xf32>
    %33 = arith.truncf %32 : vector<240x128xf32> to vector<240x128xbf16>
    %c17_26 = arith.constant 17 : index
    %c0_27 = arith.constant 0 : index
    %34 = vector.load %arg7[%c17_26, %c0_27] : memref<272x128xf32, #tpu.memory_space<vmem>>, vector<240x128xf32>
    %35 = arith.truncf %34 : vector<240x128xf32> to vector<240x128xbf16>
    %c3 = arith.constant 3 : index
    %c0_28 = arith.constant 0 : index
    %c0_29 = arith.constant 0 : index
    %36 = vector.load %arg4[%c3, %c0_28, %c0_29] : memref<9x128x128xbf16, #tpu.memory_space<vmem>>, vector<1x128x128xbf16>
    %37 = vector.shape_cast %36 : vector<1x128x128xbf16> to vector<128x128xbf16>
    %cst_30 = arith.constant dense<0.000000e+00> : vector<240x128xf32>
    %38 = tpu.matmul %31, %37, %cst_30 {dimension_numbers = #tpu.dot_dimension_numbers<[1], [0], [0], [1], [0, 0, 1, 1], [], []>} : vector<240x128xbf16>, vector<128x128xbf16>, vector<240x128xf32> -> vector<240x128xf32>
    %c4 = arith.constant 4 : index
    %c0_31 = arith.constant 0 : index
    %c0_32 = arith.constant 0 : index
    %39 = vector.load %arg4[%c4, %c0_31, %c0_32] : memref<9x128x128xbf16, #tpu.memory_space<vmem>>, vector<1x128x128xbf16>
    %40 = vector.shape_cast %39 : vector<1x128x128xbf16> to vector<128x128xbf16>
    %cst_33 = arith.constant dense<0.000000e+00> : vector<240x128xf32>
    %41 = tpu.matmul %33, %40, %cst_33 {dimension_numbers = #tpu.dot_dimension_numbers<[1], [0], [0], [1], [0, 0, 1, 1], [], []>} : vector<240x128xbf16>, vector<128x128xbf16>, vector<240x128xf32> -> vector<240x128xf32>
    %42 = arith.addf %38, %41 : vector<240x128xf32>
    %c5 = arith.constant 5 : index
    %c0_34 = arith.constant 0 : index
    %c0_35 = arith.constant 0 : index
    %43 = vector.load %arg4[%c5, %c0_34, %c0_35] : memref<9x128x128xbf16, #tpu.memory_space<vmem>>, vector<1x128x128xbf16>
    %44 = vector.shape_cast %43 : vector<1x128x128xbf16> to vector<128x128xbf16>
    %cst_36 = arith.constant dense<0.000000e+00> : vector<240x128xf32>
    %45 = tpu.matmul %35, %44, %cst_36 {dimension_numbers = #tpu.dot_dimension_numbers<[1], [0], [0], [1], [0, 0, 1, 1], [], []>} : vector<240x128xbf16>, vector<128x128xbf16>, vector<240x128xf32> -> vector<240x128xf32>
    %46 = arith.addf %42, %45 : vector<240x128xf32>
    %c1_37 = arith.constant 1 : index
    %c0_38 = arith.constant 0 : index
    %c0_39 = arith.constant 0 : index
    %47 = vector.load %arg5[%c1_37, %c0_38, %c0_39] : memref<3x1x128xf32, #tpu.memory_space<vmem>>, vector<1x1x128xf32>
    %48 = vector.shape_cast %47 : vector<1x1x128xf32> to vector<1x128xf32>
    %49 = vector.broadcast %48 : vector<1x128xf32> to vector<240x128xf32>
    %50 = arith.addf %46, %49 : vector<240x128xf32>
    %51 = arith.mulf %50, %4 : vector<240x128xf32>
    %cst_40 = arith.constant 0.000000e+00 : f32
    %52 = vector.broadcast %cst_40 : f32 to vector<240x128xf32>
    %53 = arith.maximumf %51, %52 : vector<240x128xf32>
    %c16_41 = arith.constant 16 : index
    %c0_42 = arith.constant 0 : index
    %54 = vector.load %arg7[%c16_41, %c0_42] : memref<272x128xf32, #tpu.memory_space<vmem>>, vector<240x128xf32>
    tpu.vector_store %arg7[%c16_41, %c0_42], %53 {strides = array<i32>} : memref<272x128xf32, #tpu.memory_space<vmem>>, vector<240x128xf32>,
    %c15_43 = arith.constant 15 : index
    %c0_44 = arith.constant 0 : index
    %55 = vector.load %arg7[%c15_43, %c0_44] : memref<272x128xf32, #tpu.memory_space<vmem>>, vector<240x128xf32>
    %56 = arith.truncf %55 : vector<240x128xf32> to vector<240x128xbf16>
    %c16_45 = arith.constant 16 : index
    %c0_46 = arith.constant 0 : index
    %57 = vector.load %arg7[%c16_45, %c0_46] : memref<272x128xf32, #tpu.memory_space<vmem>>, vector<240x128xf32>
    %58 = arith.truncf %57 : vector<240x128xf32> to vector<240x128xbf16>
    %c17_47 = arith.constant 17 : index
    %c0_48 = arith.constant 0 : index
    %59 = vector.load %arg7[%c17_47, %c0_48] : memref<272x128xf32, #tpu.memory_space<vmem>>, vector<240x128xf32>
    %60 = arith.truncf %59 : vector<240x128xf32> to vector<240x128xbf16>
    %c6 = arith.constant 6 : index
    %c0_49 = arith.constant 0 : index
    %c0_50 = arith.constant 0 : index
    %61 = vector.load %arg4[%c6, %c0_49, %c0_50] : memref<9x128x128xbf16, #tpu.memory_space<vmem>>, vector<1x128x128xbf16>
    %62 = vector.shape_cast %61 : vector<1x128x128xbf16> to vector<128x128xbf16>
    %cst_51 = arith.constant dense<0.000000e+00> : vector<240x128xf32>
    %63 = tpu.matmul %56, %62, %cst_51 {dimension_numbers = #tpu.dot_dimension_numbers<[1], [0], [0], [1], [0, 0, 1, 1], [], []>} : vector<240x128xbf16>, vector<128x128xbf16>, vector<240x128xf32> -> vector<240x128xf32>
    %c7 = arith.constant 7 : index
    %c0_52 = arith.constant 0 : index
    %c0_53 = arith.constant 0 : index
    %64 = vector.load %arg4[%c7, %c0_52, %c0_53] : memref<9x128x128xbf16, #tpu.memory_space<vmem>>, vector<1x128x128xbf16>
    %65 = vector.shape_cast %64 : vector<1x128x128xbf16> to vector<128x128xbf16>
    %cst_54 = arith.constant dense<0.000000e+00> : vector<240x128xf32>
    %66 = tpu.matmul %58, %65, %cst_54 {dimension_numbers = #tpu.dot_dimension_numbers<[1], [0], [0], [1], [0, 0, 1, 1], [], []>} : vector<240x128xbf16>, vector<128x128xbf16>, vector<240x128xf32> -> vector<240x128xf32>
    %67 = arith.addf %63, %66 : vector<240x128xf32>
    %c8 = arith.constant 8 : index
    %c0_55 = arith.constant 0 : index
    %c0_56 = arith.constant 0 : index
    %68 = vector.load %arg4[%c8, %c0_55, %c0_56] : memref<9x128x128xbf16, #tpu.memory_space<vmem>>, vector<1x128x128xbf16>
    %69 = vector.shape_cast %68 : vector<1x128x128xbf16> to vector<128x128xbf16>
    %cst_57 = arith.constant dense<0.000000e+00> : vector<240x128xf32>
    %70 = tpu.matmul %60, %69, %cst_57 {dimension_numbers = #tpu.dot_dimension_numbers<[1], [0], [0], [1], [0, 0, 1, 1], [], []>} : vector<240x128xbf16>, vector<128x128xbf16>, vector<240x128xf32> -> vector<240x128xf32>
    %71 = arith.addf %67, %70 : vector<240x128xf32>
    %c2_58 = arith.constant 2 : index
    %c0_59 = arith.constant 0 : index
    %c0_60 = arith.constant 0 : index
    %72 = vector.load %arg5[%c2_58, %c0_59, %c0_60] : memref<3x1x128xf32, #tpu.memory_space<vmem>>, vector<1x1x128xf32>
    %73 = vector.shape_cast %72 : vector<1x1x128xf32> to vector<1x128xf32>
    %74 = vector.broadcast %73 : vector<1x128xf32> to vector<240x128xf32>
    %75 = arith.addf %71, %74 : vector<240x128xf32>
    %76 = arith.mulf %75, %4 : vector<240x128xf32>
    %c0_61 = arith.constant 0 : index
    %c0_62 = arith.constant 0 : index
    %77 = vector.load %arg3[%c0_61, %c0_62] : memref<240x1xf32, #tpu.memory_space<vmem>>, vector<240x1xf32>
    %78 = vector.broadcast %77 : vector<240x1xf32> to vector<240x128xf32>
    %79 = arith.mulf %76, %78 : vector<240x128xf32>
    %cst_63 = arith.constant 0.000000e+00 : f32
    %80 = vector.broadcast %cst_63 : f32 to vector<240x128xf32>
    %81 = arith.maximumf %79, %80 : vector<240x128xf32>
    %82 = tpu.iota {dimensions = array<i32: 1>} : vector<1x128xi32>
    %c4_i32 = arith.constant 4 : i32
    %83 = vector.broadcast %c4_i32 : i32 to vector<1x128xi32>
    %84 = arith.cmpi slt, %82, %83 : vector<1x128xi32>
    %85 = vector.shape_cast %84 : vector<1x128xi1> to vector<1x128xi1>
    %86 = vector.broadcast %85 : vector<1x128xi1> to vector<240x128xi1>
    %87 = arith.select %86, %76, %81 : vector<240x128xi1>, vector<240x128xf32>
    %c0_64 = arith.constant 0 : index
    %c0_65 = arith.constant 0 : index
    %88 = vector.load %arg6[%c0_64, %c0_65] : memref<240x128xf32, #tpu.memory_space<vmem>>, vector<240x128xf32>
    tpu.vector_store %arg6[%c0_64, %c0_65], %87 {strides = array<i32>} : memref<240x128xf32, #tpu.memory_space<vmem>>, vector<240x128xf32>,
    return
  }
  func.func @transform_0(%arg0: i32) -> (i32, i32) {
    %c0_i32 = arith.constant 0 : i32
    %c0_i32_0 = arith.constant 0 : i32
    %c0_i32_1 = arith.constant 0 : i32
    return %c0_i32, %c0_i32_0 : i32, i32
  }
  func.func @transform_1(%arg0: i32) -> (i32, i32) {
    %c0_i32 = arith.constant 0 : i32
    %c0_i32_0 = arith.constant 0 : i32
    %c0_i32_1 = arith.constant 0 : i32
    return %c0_i32, %c0_i32_0 : i32, i32
  }
  func.func @transform_2(%arg0: i32) -> (i32, i32) {
    %c0_i32 = arith.constant 0 : i32
    %c0_i32_0 = arith.constant 0 : i32
    %c0_i32_1 = arith.constant 0 : i32
    return %c0_i32, %c0_i32_0 : i32, i32
  }
  func.func @transform_3(%arg0: i32) -> (i32, i32, i32) {
    %c0_i32 = arith.constant 0 : i32
    %c0_i32_0 = arith.constant 0 : i32
    %c0_i32_1 = arith.constant 0 : i32
    %c0_i32_2 = arith.constant 0 : i32
    return %c0_i32, %c0_i32_0, %c0_i32_1 : i32, i32, i32
  }
  func.func @transform_4(%arg0: i32) -> (i32, i32, i32) {
    %c0_i32 = arith.constant 0 : i32
    %c0_i32_0 = arith.constant 0 : i32
    %c0_i32_1 = arith.constant 0 : i32
    %c0_i32_2 = arith.constant 0 : i32
    return %c0_i32, %c0_i32_0, %c0_i32_1 : i32, i32, i32
  }
  func.func @transform_5(%arg0: i32) -> (i32, i32) {
    %c0_i32 = arith.constant 0 : i32
    %c0_i32_0 = arith.constant 0 : i32
    %c0_i32_1 = arith.constant 0 : i32
    return %c0_i32, %c0_i32_0 : i32, i32
  }
}

</mosaic_0001>

<bundles_post_ra>
// kernel: tpu_custom_call.1
= control target key start
LH: loop header
LB: loop body
LE: loop exit
PB: predicated region body
PF: predicated region fallthrough
CT: control target
= control target key end

     0   :  { %10 = vsyncpa [#allocation4], 0  ;;  %s4150_s0 = inlined_call_operand.vmem [shape: f32[272,128], index: 0, kind: input, shape index: {}]   ;;  %s4151_s1 = inlined_call_operand.vmem [shape: f32[240,1], index: 1, kind: input, shape index: {}]   ;;  %s4152_s2 = inlined_call_operand.vmem [shape: f32[240,1], index: 2, kind: input, shape index: {}]   ;;  %s4153_s3 = inlined_call_operand.hbm [shape: bf16[9,128,128], index: 3, kind: input, shape index: {}]   ;;  %s4154_s4 = inlined_call_operand.vmem [shape: f32[3,1,128], index: 4, kind: input, shape index: {}]   ;;  %s4155_s5 = inlined_call_operand.hbm [shape: f32[240,128], index: 5, kind: output, shape index: {}]  }
   0x1   :  { %11 = vsyncpa [#allocation5], 0  ;;  %s22_s20 = sshll.u32 %s4153_s3, 4  ;;  %s3178_s21 = smov [#allocation3]   ;;  %s23_s20 = int_to_ptr.hbm [resolvable:$true] %s22_s20 }
   0x2   :  { %s24_s22 = sshll.u32 %s3178_s21, 4  ;;  %s3179_s23 = smov 64   ;;  %s25_s22 = int_to_ptr.vmem [resolvable:$true] %s24_s22 }
   0x3   :  { %s3180_s24 = smov 4  }
   0x4   :  { %30 = dma.hbm_to_vmem [thread:$0]  %s23_s20, 9216, %s25_s22, [#allocation4], %s3179_s23, %s3179_s23, %s3180_s24  }
   0x5   :  { %3174 = dma.done.wait [#allocation4], 9216  }
   0x6   :  { %3175 = vsyncadd [#allocation4], 4294958080  ;;  %v3181_v0 = vmov 0   ;;  %v3182_v1 = vmov 0.0   ;;  %v73_v2 = vld [vmem:[%s4151_s1 + $0x10] sm:$0xff]  ;;  %v71_v3 = vld [vmem:[%s4151_s1] sm:$0xff] }
   0x7   :  { %3119 = vset.pattern.permute.xlu1 %v3181_v0  ;;  %3118 = vset.pattern.permute.xlu0 %v3181_v0  ;;  %38 = vst [vmem:[#allocation2 + $0x8] sm:$0xff] %v3182_v1  ;;  %v3029_v4 = vld [vmem:[#allocation3 + $0x78] sm:$0xff]  ;;  %v3028_v5 = vld [vmem:[#allocation3 + $0x70] sm:$0xff]  ;;  %v74_v7 = vld [vmem:[%s4151_s1 + $0x18] sm:$0xff]  ;;  %s2711_s13 = sshll.u32 %s4155_s5, 4  ;;  %s3184_s14 = smov 128   ;;  %s2712_s13 = int_to_ptr.hbm [resolvable:$true] %s2711_s13 }
   0x8   :  { %3120 = vset.pattern.permute.xlu2 %v3181_v0  ;;  %69 = vst [vmem:[#allocation2 + $0x100] sm:$0xff] %v3182_v1  ;;  %113 = vperm.xlu1 %3119, %v73_v2   ;;  %v75_v6 = vld [vmem:[%s4151_s1 + $0x20] sm:$0xff]  ;;  %v72_v8 = vld [vmem:[%s4151_s1 + $0x8] sm:$0xff]  ;;  %v3027_v9 = vld [vmem:[#allocation3 + $0x68] sm:$0xff]  ;;  %s3185_s15 = smov 8  }
   0x9   :  { %103 = vperm.xlu0 %3118, %v71_v3   ;;  %3086 = vmatpush.bf16.msra.mxu1 %v3029_v4  ;;  %v3026_v10 = vld [vmem:[#allocation3 + $0x60] sm:$0xff]  ;;  %v76_v11 = vld [vmem:[%s4151_s1 + $0x28] sm:$0xff]  ;;  %v78_v12 = vld [vmem:[%s4151_s1 + $0x38] sm:$0xff] }
   0xa   :  { %3087 = vmatpush.bf16.msra.mxu2 %v3029_v4  ;;  %467 = vmatpush.bf16.msra.mxu0 %v3029_v4  ;;  %v77_v13 = vld [vmem:[%s4151_s1 + $0x30] sm:$0xff]  ;;  %v3025_v14 = vld [vmem:[#allocation3 + $0x58] sm:$0xff]  ;;  %v3024_v15 = vld [vmem:[#allocation3 + $0x50] sm:$0xff] }
   0xb   :  { %3088 = vmatpush.bf16.msra.mxu3 %v3029_v4  ;;  %123 = vperm.xlu2 %3120, %v75_v6   ;;  %v79_v16 = vld [vmem:[%s4151_s1 + $0x40] sm:$0xff]  ;;  %v81_v17 = vld [vmem:[%s4151_s1 + $0x50] sm:$0xff]  ;;  %v80_v18 = vld [vmem:[%s4151_s1 + $0x48] sm:$0xff] }
   0xc   :  { %v3023_v19 = vld [vmem:[#allocation3 + $0x48] sm:$0xff]  ;;  %v3022_v20 = vld [vmem:[#allocation3 + $0x40] sm:$0xff]  ;;  %v3037_v26 = vld [vmem:[#allocation3 + $0xb8] sm:$0xff] }
   0xd   :  { %3089 = vmatpush.bf16.msra.mxu1 %v3028_v5  ;;  %v304_v21 = vld [vmem:[%s4150_s0 + $0x50] sm:$0xff]  ;;  %v305_v22 = vld [vmem:[%s4150_s0 + $0x58] sm:$0xff]  ;;  %v3021_v27 = vld [vmem:[#allocation3 + $0x38] sm:$0xff] }
   0xe   :  { %3090 = vmatpush.bf16.msra.mxu2 %v3028_v5  ;;  %468 = vmatpush.bf16.msra.mxu0 %v3028_v5  ;;  %v312_v23 = vld [vmem:[%s4150_s0 + $0x90] sm:$0xff]  ;;  %v82_v24 = vld [vmem:[%s4151_s1 + $0x58] sm:$0xff]  ;;  %v84_v28 = vld [vmem:[%s4151_s1 + $0x68] sm:$0xff]  ;;  %v330_v30 = vpack.c.bf16 %v305_v22, %v304_v21 }
   0xf   :  { %3091 = vmatpush.bf16.msra.mxu3 %v3028_v5  ;;  %v313_v25 = vld [vmem:[%s4150_s0 + $0x98] sm:$0xff]  ;;  %v83_v29 = vld [vmem:[%s4151_s1 + $0x60] sm:$0xff]  ;;  %v85_v34 = vld [vmem:[%s4151_s1 + $0x70] sm:$0xff] }
  0x10   :  { %118 = vperm.xlu1 %3119, %v74_v7   ;;  %v334_v31 = vpack.c.bf16 %v313_v25, %v312_v23  ;;  %v3036_v32 = vld [vmem:[#allocation3 + $0xb0] sm:$0xff]  ;;  %v3035_v35 = vld [vmem:[#allocation3 + $0xa8] sm:$0xff]  ;;  %v3034_v39 = vld [vmem:[#allocation3 + $0xa0] sm:$0xff] }
  0x11   :  { %108 = vperm.xlu0 %3118, %v72_v8   ;;  %3092 = vmatpush.bf16.msra.mxu1 %v3027_v9  ;;  %v3020_v33 = vld [vmem:[#allocation3 + $0x30] sm:$0xff]  ;;  %v3019_v36 = vld [vmem:[#allocation3 + $0x28] sm:$0xff]  ;;  %v3018_v40 = vld [vmem:[#allocation3 + $0x20] sm:$0xff] }
  0x12   :  { %3093 = vmatpush.bf16.msra.mxu2 %v3027_v9  ;;  %469 = vmatpush.bf16.msra.mxu0 %v3027_v9  ;;  %v87_v37 = vld [vmem:[%s4151_s1 + $0x80] sm:$0xff]  ;;  %v86_v38 = vld [vmem:[%s4151_s1 + $0x78] sm:$0xff]  ;;  %v307_v42 = vld [vmem:[%s4150_s0 + $0x68] sm:$0xff] }
  0x13   :  { %3094 = vmatpush.bf16.msra.mxu3 %v3027_v9  ;;  %128 = vperm.xlu2 %3120, %v76_v11   ;;  %v306_v41 = vld [vmem:[%s4150_s0 + $0x60] sm:$0xff]  ;;  %v88_v44 = vld [vmem:[%s4151_s1 + $0x88] sm:$0xff]  ;;  %v90_v48 = vld [vmem:[%s4151_s1 + $0x98] sm:$0xff] }
  0x14   :  { %v314_v43 = vld [vmem:[%s4150_s0 + $0xa0] sm:$0xff]  ;;  %v315_v45 = vld [vmem:[%s4150_s0 + $0xa8] sm:$0xff]  ;;  %v89_v49 = vld [vmem:[%s4151_s1 + $0x90] sm:$0xff]  ;;  %v331_v50 = vpack.c.bf16 %v307_v42, %v306_v41 }
  0x15   :  { %3095 = vmatpush.bf16.msra.mxu1 %v3026_v10  ;;  %v3033_v46 = vld [vmem:[#allocation3 + $0x98] sm:$0xff]  ;;  %v335_v51 = vpack.c.bf16 %v315_v45, %v314_v43  ;;  %v3032_v52 = vld [vmem:[#allocation3 + $0x90] sm:$0xff]  ;;  %v3031_v55 = vld [vmem:[#allocation3 + $0x88] sm:$0xff] }
  0x16   :  { %3096 = vmatpush.bf16.msra.mxu2 %v3026_v10  ;;  %470 = vmatpush.bf16.msra.mxu0 %v3026_v10  ;;  %v3017_v47 = vld [vmem:[#allocation3 + $0x18] sm:$0xff]  ;;  %v3016_v53 = vld [vmem:[#allocation3 + $0x10] sm:$0xff]  ;;  %v3015_v56 = vld [vmem:[#allocation3 + $0x8] sm:$0xff] }
  0x17   :  { %3097 = vmatpush.bf16.msra.mxu3 %v3026_v10  ;;  %v91_v54 = vld [vmem:[%s4151_s1 + $0xa0] sm:$0xff]  ;;  %v93_v57 = vld [vmem:[%s4151_s1 + $0xb0] sm:$0xff]  ;;  %v92_v58 = vld [vmem:[%s4151_s1 + $0xa8] sm:$0xff] }
  0x18   :  { %138 = vperm.xlu1 %3119, %v78_v12   ;;  %v308_v59 = vld [vmem:[%s4150_s0 + $0x70] sm:$0xff]  ;;  %v94_v62 = vld [vmem:[%s4151_s1 + $0xb8] sm:$0xff]  ;;  %v96_v5 = vld [vmem:[%s4151_s1 + $0xc8] sm:$0xff] }
  0x19   :  { %133 = vperm.xlu0 %3118, %v77_v13   ;;  %3098 = vmatpush.bf16.msra.mxu1 %v3025_v14  ;;  %v3030_v60 = vld [vmem:[#allocation3 + $0x80] sm:$0xff]  ;;  %v297_v63 = vld [vmem:[%s4150_s0 + $0x18] sm:$0xff]  ;;  %v95_v6 = vld [vmem:[%s4151_s1 + $0xc0] sm:$0xff] }
  0x1a   :  { %3099 = vmatpush.bf16.msra.mxu2 %v3025_v14  ;;  %471 = vmatpush.bf16.msra.mxu0 %v3025_v14  ;;  %v296_v61 = vld [vmem:[%s4150_s0 + $0x10] sm:$0xff]  ;;  %v309_v1 = vld [vmem:[%s4150_s0 + $0x78] sm:$0xff]  ;;  %v3061_v10 = vld [vmem:[#allocation3 + $0x178] sm:$0xff] }
  0x1b   :  { %3100 = vmatpush.bf16.msra.mxu3 %v3025_v14  ;;  %143 = vperm.xlu2 %3120, %v79_v16   ;;  %v3014_v0 = vld [vmem:[#allocation3] sm:$0xff]  ;;  %v317_v3 = vld [vmem:[%s4150_s0 + $0xb8] sm:$0xff]  ;;  %v326_v4 = vpack.c.bf16 %v297_v63, %v296_v61  ;;  %v332_v7 = vpack.c.bf16 %v309_v1, %v308_v59  ;;  %v99_v11 = vld [vmem:[%s4151_s1 + $0xe0] sm:$0xff] }
  0x1c   :  { %v316_v2 = vld [vmem:[%s4150_s0 + $0xb0] sm:$0xff]  ;;  %v98_v12 = vld [vmem:[%s4151_s1 + $0xd8] sm:$0xff]  ;;  %v298_v13 = vld [vmem:[%s4150_s0 + $0x20] sm:$0xff] }
  0x1d   :  { %3101 = vmatpush.bf16.msra.mxu1 %v3024_v15  ;;  %v336_v8 = vpack.c.bf16 %v317_v3, %v316_v2  ;;  %v97_v9 = vld [vmem:[%s4151_s1 + $0xd0] sm:$0xff]  ;;  %v299_v14 = vld [vmem:[%s4150_s0 + $0x28] sm:$0xff]  ;;  %v2400_v22 = vld [vmem:[%s4152_s2] sm:$0xff] }
  0x1e   :  { %3102 = vmatpush.bf16.msra.mxu2 %v3024_v15  ;;  %472 = vmatpush.bf16.msra.mxu0 %v3024_v15  ;;  %v100_v16 = vld [vmem:[%s4151_s1 + $0xe8] sm:$0xff]  ;;  %v2402_v25 = vld [vmem:[%s4152_s2 + $0x10] sm:$0xff]  ;;  %v3060_v41 = vld [vmem:[#allocation3 + $0x170] sm:$0xff] }
  0x1f   :  { %3103 = vmatpush.bf16.msra.mxu3 %v3024_v15  ;;  %v310_v15 = vld [vmem:[%s4150_s0 + $0x80] sm:$0xff]  ;;  %v2401_v21 = vld [vmem:[%s4152_s2 + $0x8] sm:$0xff]  ;;  %v2410_v42 = vld [vmem:[%s4152_s2 + $0x50] sm:$0xff] }
  0x20   :  { %153 = vperm.xlu1 %3119, %v81_v17   ;;  %v327_v17 = vpack.c.bf16 %v299_v14, %v298_v13  ;;  %v2409_v43 = vld [vmem:[%s4152_s2 + $0x48] sm:$0xff]  ;;  %v256_v61 = vld [vmem:[%s4150_s0 + $0x37] sm:$0xff]  ;;  %v2424_v14 = vld [vmem:[%s4152_s2 + $0xc0] sm:$0xff] }
  0x21   :  { %148 = vperm.xlu0 %3118, %v80_v18   ;;  %3104 = vmatpush.bf16.msra.mxu1 %v3023_v19  ;;  %v311_v18 = vld [vmem:[%s4150_s0 + $0x88] sm:$0xff]  ;;  %v346_v63 = vld [vmem:[%s4150_s0 + $0x39] sm:$0xff]  ;;  %v2418_v1 = vld [vmem:[%s4152_s2 + $0x90] sm:$0xff] }
  0x22   :  { %3105 = vmatpush.bf16.msra.mxu2 %v3023_v19  ;;  %473 = vmatpush.bf16.msra.mxu0 %v3023_v19  ;;  %v333_v23 = vpack.c.bf16 %v311_v18, %v310_v15  ;;  %v254_v45 = vld [vmem:[%s4150_s0 + $0x27] sm:$0xff]  ;;  %v255_v59 = vld [vmem:[%s4150_s0 + $0x2f] sm:$0xff] }
  0x23   :  { %3106 = vmatpush.bf16.msra.mxu3 %v3023_v19  ;;  %158 = vperm.xlu2 %3120, %v82_v24   ;;  %v318_v19 = vld [vmem:[%s4150_s0 + $0xc0] sm:$0xff]  ;;  %v283_v2 = vpack.c.bf16 %v256_v61, %v255_v59  ;;  %v2425_v13 = vld [vmem:[%s4152_s2 + $0xc8] sm:$0xff]  ;;  %v3042_v61 = vld [vmem:[#allocation3 + $0xe0] sm:$0xff] }
  0x24   :  { %v2428_v18 = vld [vmem:[%s4152_s2 + $0xe0] sm:$0xff] }
  0x25   :  { %3107 = vmatpush.bf16.msra.mxu1 %v3022_v20 }
  0x26   :  { %3108 = vmatpush.bf16.msra.mxu2 %v3022_v20  ;;  %474 = vmatpush.bf16.msra.mxu0 %v3022_v20 }
  0x27   :  { %3109 = vmatpush.bf16.msra.mxu3 %v3022_v20  ;;  %v319_v20 = vld [vmem:[%s4150_s0 + $0xc8] sm:$0xff] }
  0x28   :  { %168 = vperm.xlu1 %3119, %v84_v28   ;;  %495 = vmatmul.bf16.vlgmr.msra.gmra.mxu1 %v330_v30  ;;  %v337_v24 = vpack.c.bf16 %v319_v20, %v318_v19  ;;  %v251_v28 = vld [vmem:[%s4150_s0 + $0xf] sm:$0xff]  ;;  %v2427_v19 = vld [vmem:[%s4152_s2 + $0xd8] sm:$0xff] }
  0x29   :  { %599 = vmatpush.bf16.msrb.mxu1 %v3021_v27  ;;  %163 = vperm.xlu0 %3118, %v83_v29   ;;  %v2403_v27 = vld [vmem:[%s4152_s2 + $0x18] sm:$0xff]  ;;  %v259_v20 = vld [vmem:[%s4150_s0 + $0x4f] sm:$0xff] }
  0x2a   :  { %748 = vmatpush.bf16.msrb.mxu2 %v3037_v26  ;;  %475 = vmatmul.bf16.vlgmr.msra.gmra.mxu0 %v326_v4  ;;  %v2404_v26 = vld [vmem:[%s4152_s2 + $0x20] sm:$0xff]  ;;  %v252_v29 = vld [vmem:[%s4150_s0 + $0x17] sm:$0xff] }
  0x2b   :  { %515 = vmatmul.bf16.vlgmr.msra.gmra.mxu2 %v334_v31  ;;  %173 = vperm.xlu2 %3120, %v85_v34   ;;  %v341_v30 = vld [vmem:[%s4150_s0 + $0x11] sm:$0xff]  ;;  %v2405_v31 = vld [vmem:[%s4152_s2 + $0x28] sm:$0xff]  ;;  %v2420_v4 = vld [vmem:[%s4152_s2 + $0xa0] sm:$0xff] }
  0x2c   :  { %v301_v34 = vld [vmem:[%s4150_s0 + $0x38] sm:$0xff] }
  0x2d   :  { %600 = vmatpush.bf16.msrb.mxu1 %v3020_v33  ;;  %v300_v33 = vld [vmem:[%s4150_s0 + $0x30] sm:$0xff] }
  0x2e   :  { %749 = vmatpush.bf16.msrb.mxu2 %v3036_v32  ;;  %v342_v32 = vld [vmem:[%s4150_s0 + $0x19] sm:$0xff] }
  0x30   :  { %183 = vperm.xlu1 %3119, %v87_v37   ;;  %v2406_v37 = vld [vmem:[%s4152_s2 + $0x30] sm:$0xff] }
  0x31   :  { %601 = vmatpush.bf16.msrb.mxu1 %v3019_v36  ;;  %178 = vperm.xlu0 %3118, %v86_v38   ;;  %v2407_v36 = vld [vmem:[%s4152_s2 + $0x38] sm:$0xff]  ;;  %v281_v38 = vpack.c.bf16 %v252_v29, %v251_v28  ;;  %v320_v28 = vld [vmem:[%s4150_s0 + $0xd0] sm:$0xff] }
  0x32   :  { %750 = vmatpush.bf16.msrb.mxu2 %v3035_v35  ;;  %v328_v35 = vpack.c.bf16 %v301_v34, %v300_v33  ;;  %v321_v29 = vld [vmem:[%s4150_s0 + $0xd8] sm:$0xff]  ;;  %v3045_v34 = vld [vmem:[#allocation3 + $0xf8] sm:$0xff] }
  0x33   :  { %188 = vperm.xlu2 %3120, %v88_v44   ;;  %v253_v44 = vld [vmem:[%s4150_s0 + $0x1f] sm:$0xff]  ;;  %1335 = vmatpush.bf16.msrb.mxu0 %v3045_v34 }
  0x35   :  { %602 = vmatpush.bf16.msrb.mxu1 %v3018_v40  ;;  %v2408_v40 = vld [vmem:[%s4152_s2 + $0x40] sm:$0xff] }
  0x36   :  { %751 = vmatpush.bf16.msrb.mxu2 %v3034_v39  ;;  %v371_v39 = vpack.c.bf16 %v342_v32, %v341_v30  ;;  %v338_v30 = vpack.c.bf16 %v321_v29, %v320_v28  ;;  %v3038_v28 = vld [vmem:[#allocation3 + $0xc0] sm:$0xff] }
  0x38   :  { %198 = vperm.xlu1 %3119, %v90_v48   ;;  %500 = vmatmul.bf16.gmra.mxu1 %v331_v50  ;;  %v344_v48 = vld [vmem:[%s4150_s0 + $0x29] sm:$0xff] }
  0x39   :  { %603 = vmatpush.bf16.msrb.mxu1 %v3017_v47  ;;  %193 = vperm.xlu0 %3118, %v89_v49   ;;  %v2411_v47 = vld [vmem:[%s4152_s2 + $0x58] sm:$0xff]  ;;  %v302_v49 = vld [vmem:[%s4150_s0 + $0x40] sm:$0xff]  ;;  %v303_v50 = vld [vmem:[%s4150_s0 + $0x48] sm:$0xff] }
  0x3a   :  { %752 = vmatpush.bf16.msrb.mxu2 %v3033_v46  ;;  %480 = vmatmul.bf16.gmra.mxu0 %v327_v17  ;;  %v343_v46 = vld [vmem:[%s4150_s0 + $0x21] sm:$0xff]  ;;  %v2426_v17 = vld [vmem:[%s4152_s2 + $0xd0] sm:$0xff] }
  0x3b   :  { %520 = vmatmul.bf16.gmra.mxu2 %v335_v51  ;;  %203 = vperm.xlu2 %3120, %v91_v54   ;;  %v329_v51 = vpack.c.bf16 %v303_v50, %v302_v49  ;;  %v282_v54 = vpack.c.bf16 %v254_v45, %v253_v44  ;;  %v3044_v44 = vld [vmem:[#allocation3 + $0xf0] sm:$0xff] }
  0x3c   :  { %535 = vmatmul.bf16.vlgmr.msra.gmra.mxu3 %v338_v30  ;;  %1336 = vmatpush.bf16.msrb.mxu0 %v3044_v44  ;;  %v322_v45 = vld [vmem:[%s4150_s0 + $0xe0] sm:$0xff]  ;;  %v3069_v44 = vld [vmem:[#allocation3 + $0x1b8] sm:$0xff] }
  0x3d   :  { %604 = vmatpush.bf16.msrb.mxu1 %v3016_v53  ;;  %v2412_v53 = vld [vmem:[%s4152_s2 + $0x60] sm:$0xff] }
  0x3e   :  { %753 = vmatpush.bf16.msrb.mxu2 %v3032_v52  ;;  %v2413_v52 = vld [vmem:[%s4152_s2 + $0x68] sm:$0xff]  ;;  %v3052_v49 = vld [vmem:[#allocation3 + $0x130] sm:$0xff] }
  0x40   :  { %213 = vperm.xlu1 %3119, %v93_v57   ;;  %v2416_v57 = vld [vmem:[%s4152_s2 + $0x80] sm:$0xff] }
  0x41   :  { %605 = vmatpush.bf16.msrb.mxu1 %v3015_v56  ;;  %208 = vperm.xlu0 %3118, %v92_v58   ;;  %v2414_v56 = vld [vmem:[%s4152_s2 + $0x70] sm:$0xff]  ;;  %v2415_v58 = vld [vmem:[%s4152_s2 + $0x78] sm:$0xff] }
  0x42   :  { %754 = vmatpush.bf16.msrb.mxu2 %v3031_v55  ;;  %v372_v55 = vpack.c.bf16 %v344_v48, %v343_v46  ;;  %v323_v46 = vld [vmem:[%s4150_s0 + $0xe8] sm:$0xff] }
  0x43   :  { %218 = vperm.xlu2 %3120, %v94_v62   ;;  %v345_v62 = vld [vmem:[%s4150_s0 + $0x31] sm:$0xff] }
  0x44   :  { %v373_v3 = vpack.c.bf16 %v346_v63, %v345_v62  ;;  %v3057_v62 = vld [vmem:[#allocation3 + $0x158] sm:$0xff]  ;;  %v324_v63 = vld [vmem:[%s4150_s0 + $0xf0] sm:$0xff] }
  0x45   :  { %606 = vmatpush.bf16.msrb.mxu1 %v3014_v0  ;;  %v2419_v0 = vld [vmem:[%s4152_s2 + $0x98] sm:$0xff] }
  0x46   :  { %755 = vmatpush.bf16.msrb.mxu2 %v3030_v60  ;;  %v2417_v60 = vld [vmem:[%s4152_s2 + $0x88] sm:$0xff] }
  0x48   :  { %228 = vperm.xlu1 %3119, %v96_v5   ;;  %505 = vmatmul.bf16.gmra.mxu1 %v332_v7  ;;  %v3059_v5 = vld [vmem:[#allocation3 + $0x168] sm:$0xff]  ;;  %v2421_v7 = vld [vmem:[%s4152_s2 + $0xa8] sm:$0xff] }
  0x49   :  { %223 = vperm.xlu0 %3118, %v95_v6   ;;  %1484 = vmatpush.bf16.msra.mxu1 %v3061_v10  ;;  %v2422_v6 = vld [vmem:[%s4152_s2 + $0xb0] sm:$0xff]  ;;  %v258_v10 = vld [vmem:[%s4150_s0 + $0x47] sm:$0xff] }
  0x4a   :  { %485 = vmatmul.bf16.gmra.mxu0 %v328_v35  ;;  %v261_v35 = vld [vmem:[%s4150_s0 + $0x5f] sm:$0xff] }
  0x4b   :  { %525 = vmatmul.bf16.gmra.mxu2 %v336_v8  ;;  %233 = vperm.xlu2 %3120, %v97_v9   ;;  %v257_v8 = vld [vmem:[%s4150_s0 + $0x3f] sm:$0xff] }
  0x4c   :  { %v2423_v9 = vld [vmem:[%s4152_s2 + $0xb8] sm:$0xff]  ;;  %v284_v15 = vpack.c.bf16 %v258_v10, %v257_v8  ;;  %v355_v8 = vld [vmem:[%s4150_s0 + $0x81] sm:$0xff] }
  0x4d   :  { %1485 = vmatpush.bf16.msra.mxu1 %v3060_v41  ;;  %v3048_v10 = vld [vmem:[#allocation3 + $0x110] sm:$0xff] }
  0x50   :  { %243 = vperm.xlu1 %3119, %v99_v11   ;;  %v347_v11 = vld [vmem:[%s4150_s0 + $0x41] sm:$0xff] }
  0x51   :  { %238 = vperm.xlu0 %3118, %v98_v12   ;;  %1486 = vmatpush.bf16.msra.mxu1 %v3059_v5  ;;  %v348_v12 = vld [vmem:[%s4150_s0 + $0x49] sm:$0xff] }
  0x52   :  { %v3049_v5 = vld [vmem:[#allocation3 + $0x118] sm:$0xff] }
  0x53   :  { %248 = vperm.xlu2 %3120, %v100_v16   ;;  %v374_v16 = vpack.c.bf16 %v348_v12, %v347_v11 }
  0x58   :  { %2437 = vperm.xlu1 %3119, %v2401_v21   ;;  %510 = vmatmul.bf16.gmra.mxu1 %v333_v23  ;;  %v2429_v21 = vld [vmem:[%s4152_s2 + $0xe8] sm:$0xff]  ;;  %v349_v23 = vld [vmem:[%s4150_s0 + $0x51] sm:$0xff] }
  0x59   :  { %2432 = vperm.xlu0 %3118, %v2400_v22   ;;  %v260_v22 = vld [vmem:[%s4150_s0 + $0x57] sm:$0xff] }
  0x5a   :  { %490 = vmatmul.bf16.gmra.mxu0 %v329_v51  ;;  %v3043_v51 = vld [vmem:[#allocation3 + $0xe8] sm:$0xff] }
  0x5b   :  { %530 = vmatmul.bf16.gmra.mxu2 %v337_v24  ;;  %2442 = vperm.xlu2 %3120, %v2402_v25   ;;  %v350_v24 = vld [vmem:[%s4150_s0 + $0x59] sm:$0xff]  ;;  %v285_v25 = vpack.c.bf16 %v260_v22, %v259_v20 }
  0x5c   :  { %1337 = vmatpush.bf16.msrb.mxu0 %v3043_v51  ;;  %v3039_v22 = vld [vmem:[#allocation3 + $0xc8] sm:$0xff] }
  0x60   :  { %2452 = vperm.xlu1 %3119, %v2404_v26   ;;  %v375_v26 = vpack.c.bf16 %v350_v24, %v349_v23  ;;  %1338 = vmatpush.bf16.msrb.mxu0 %v3042_v61  ;;  %v267_v23 = vld [vmem:[%s4150_s0 + $0x8f] sm:$0xff]  ;;  %v268_v24 = vld [vmem:[%s4150_s0 + $0x97] sm:$0xff] }
  0x61   :  { %2447 = vperm.xlu0 %3118, %v2403_v27   ;;  %v289_v30 = vpack.c.bf16 %v268_v24, %v267_v23  ;;  %v361_v23 = vld [vmem:[%s4150_s0 + $0xb1] sm:$0xff]  ;;  %v362_v24 = vld [vmem:[%s4150_s0 + $0xb9] sm:$0xff] }
  0x63   :  { %2457 = vperm.xlu2 %3120, %v2405_v31   ;;  %v3058_v31 = vld [vmem:[#allocation3 + $0x160] sm:$0xff] }
  0x64   :  { %1487 = vmatpush.bf16.msra.mxu1 %v3058_v31 }
  0x68   :  { %2467 = vperm.xlu1 %3119, %v2407_v36   ;;  %607 = vmatmul.bf16.vlgmr.msrb.gmra.mxu1 %v281_v38  ;;  %v262_v36 = vld [vmem:[%s4150_s0 + $0x67] sm:$0xff] }
  0x69   :  { %2462 = vperm.xlu0 %3118, %v2406_v37   ;;  %v351_v37 = vld [vmem:[%s4150_s0 + $0x61] sm:$0xff]  ;;  %v352_v38 = vld [vmem:[%s4150_s0 + $0x69] sm:$0xff]  ;;  %1488 = vmatpush.bf16.msra.mxu1 %v3057_v62 }
  0x6a   :  { %v376_v41 = vpack.c.bf16 %v352_v38, %v351_v37  ;;  %v3632_v37 = vld [vmem:[%s4154_s4] ss:$0 sm:$0xff] }
  0x6b   :  { %756 = vmatmul.bf16.vlgmr.msrb.gmra.mxu2 %v371_v39  ;;  %2472 = vperm.xlu2 %3120, %v2408_v40   ;;  %v286_v40 = vpack.c.bf16 %v262_v36, %v261_v35 }
  0x70   :  { %2482 = vperm.xlu1 %3119, %v2410_v42  }
  0x71   :  { %2477 = vperm.xlu0 %3118, %v2409_v43   ;;  %v3053_v43 = vld [vmem:[#allocation3 + $0x138] sm:$0xff] }
  0x72   :  { %1203 = vmatpush.bf16.msrb.mxu3 %v3053_v43  ;;  %v3077_v43 = vld [vmem:[#allocation3 + $0x1f8] sm:$0xff] }
  0x73   :  { %2487 = vperm.xlu2 %3120, %v2411_v47   ;;  %v339_v47 = vpack.c.bf16 %v323_v46, %v322_v45  ;;  %1940 = vmatpush.bf16.msra.mxu2 %v3077_v43 }
  0x75   :  { %540 = vmatmul.bf16.gmra.mxu3 %v339_v47 }
  0x76   :  { %1204 = vmatpush.bf16.msrb.mxu3 %v3052_v49 }
  0x78   :  { %2497 = vperm.xlu1 %3119, %v2413_v52   ;;  %612 = vmatmul.bf16.gmra.mxu1 %v282_v54  ;;  %v263_v52 = vld [vmem:[%s4150_s0 + $0x6f] sm:$0xff] }
  0x79   :  { %2492 = vperm.xlu0 %3118, %v2412_v53   ;;  %v264_v53 = vld [vmem:[%s4150_s0 + $0x77] sm:$0xff] }
  0x7a   :  { %v353_v54 = vld [vmem:[%s4150_s0 + $0x71] sm:$0xff] }
  0x7b   :  { %761 = vmatmul.bf16.gmra.mxu2 %v372_v55  ;;  %2502 = vperm.xlu2 %3120, %v2414_v56   ;;  %v354_v55 = vld [vmem:[%s4150_s0 + $0x79] sm:$0xff]  ;;  %v3634_v45 = vpop.permute.xlu0 %103 }
  0x7c   :  { %v3051_v56 = vld [vmem:[#allocation3 + $0x128] sm:$0xff]  ;;  %v377_v59 = vpack.c.bf16 %v354_v55, %v353_v54  ;;  %v359_v54 = vld [vmem:[%s4150_s0 + $0xa1] sm:$0xff]  ;;  %v360_v55 = vld [vmem:[%s4150_s0 + $0xa9] sm:$0xff] }
  0x7d   :  { %1205 = vmatpush.bf16.msrb.mxu3 %v3051_v56 }
  0x80   :  { %2512 = vperm.xlu1 %3119, %v2416_v57  }
  0x81   :  { %2507 = vperm.xlu0 %3118, %v2415_v58   ;;  %v287_v58 = vpack.c.bf16 %v264_v53, %v263_v52  ;;  %v269_v52 = vld [vmem:[%s4150_s0 + $0x9f] sm:$0xff]  ;;  %v270_v53 = vld [vmem:[%s4150_s0 + $0xa7] sm:$0xff] }
  0x82   :  { %v290_v62 = vpack.c.bf16 %v270_v53, %v269_v52  ;;  %v3674_v53 = vpop.permute.xlu2 %123 }
  0x83   :  { %2517 = vperm.xlu2 %3120, %v2417_v60  }
  0x88   :  { %2527 = vperm.xlu1 %3119, %v2419_v0   ;;  %617 = vmatmul.bf16.gmra.mxu1 %v283_v2  ;;  %v325_v0 = vld [vmem:[%s4150_s0 + $0xf8] sm:$0xff] }
  0x89   :  { %2522 = vperm.xlu0 %3118, %v2418_v1   ;;  %v3050_v1 = vld [vmem:[#allocation3 + $0x120] sm:$0xff]  ;;  %v340_v2 = vpack.c.bf16 %v325_v0, %v324_v63  ;;  %v380_v63 = vpack.c.bf16 %v360_v55, %v359_v54  ;;  %v3085_v0 = vld [vmem:[#allocation3 + $0x238] sm:$0xff] }
  0x8a   :  { %1206 = vmatpush.bf16.msrb.mxu3 %v3050_v1 }
  0x8b   :  { %766 = vmatmul.bf16.gmra.mxu2 %v373_v3  ;;  %2532 = vperm.xlu2 %3120, %v2420_v4  }
  0x8c   :  { %545 = vmatmul.bf16.gmra.mxu3 %v340_v2 }
  0x8e   :  { %1207 = vmatpush.bf16.msrb.mxu3 %v3049_v5  ;;  %v3651_v5 = vpop.permute.xlu0 %108 }
  0x90   :  { %2542 = vperm.xlu1 %3119, %v2422_v6   ;;  %v265_v6 = vld [vmem:[%s4150_s0 + $0x7f] sm:$0xff] }
  0x91   :  { %2537 = vperm.xlu0 %3118, %v2421_v7   ;;  %v266_v7 = vld [vmem:[%s4150_s0 + $0x87] sm:$0xff] }
  0x92   :  { %1208 = vmatpush.bf16.msrb.mxu3 %v3048_v10  ;;  %v288_v12 = vpack.c.bf16 %v266_v7, %v265_v6 }
  0x93   :  { %2547 = vperm.xlu2 %3120, %v2423_v9   ;;  %v356_v9 = vld [vmem:[%s4150_s0 + $0x89] sm:$0xff] }
  0x98   :  { %2557 = vperm.xlu1 %3119, %v2425_v13   ;;  %622 = vmatmul.bf16.gmra.mxu1 %v284_v15  ;;  %v378_v13 = vpack.c.bf16 %v356_v9, %v355_v8 }
  0x99   :  { %2552 = vperm.xlu0 %3118, %v2424_v14   ;;  %v3041_v14 = vld [vmem:[#allocation3 + $0xd8] sm:$0xff] }
  0x9a   :  { %1339 = vmatpush.bf16.msrb.mxu0 %v3041_v14  ;;  %v3654_v14 = vpop.permute.xlu1 %113 }
  0x9b   :  { %771 = vmatmul.bf16.gmra.mxu2 %v374_v16  ;;  %2562 = vperm.xlu2 %3120, %v2426_v17   ;;  %v3047_v16 = vld [vmem:[#allocation3 + $0x108] sm:$0xff]  ;;  %v3040_v17 = vld [vmem:[#allocation3 + $0xd0] sm:$0xff] }
  0x9c   :  { %1209 = vmatpush.bf16.msrb.mxu3 %v3047_v16 }
  0x9e   :  { %1340 = vmatpush.bf16.msrb.mxu0 %v3040_v17 }
  0xa0   :  { %2572 = vperm.xlu1 %3119, %v2428_v18   ;;  %v3046_v18 = vld [vmem:[#allocation3 + $0x100] sm:$0xff] }
  0xa1   :  { %2567 = vperm.xlu0 %3118, %v2427_v19   ;;  %1210 = vmatpush.bf16.msrb.mxu3 %v3046_v18 }
  0xa2   :  { %1341 = vmatpush.bf16.msrb.mxu0 %v3039_v22  ;;  %v272_v22 = vld [vmem:[%s4150_s0 + $0xb7] sm:$0xff] }
  0xa3   :  { %2577 = vperm.xlu2 %3120, %v2429_v21  }
  0xa5   :  { %v3531_v27 = vpop.f32.mrf.mxu1  ;;  %2072 = vmatpush.bf16.msra.mxu3 %v3069_v44 }
  0xa6   :  { %1342 = vmatpush.bf16.msrb.mxu0 %v3038_v28 }
  0xa7   :  { %v476_v20 = vpop.f32.mrf.mxu0 }
  0xa8   :  { %627 = vmatmul.bf16.gmra.mxu1 %v285_v25  ;;  %v357_v25 = vld [vmem:[%s4150_s0 + $0x91] sm:$0xff] }
  0xaa   :  { %2221 = vmatpush.bf16.msra.mxu0 %v3085_v0  ;;  %v273_v0 = vld [vmem:[%s4150_s0 + $0xbf] sm:$0xff] }
  0xab   :  { %776 = vmatmul.bf16.gmra.mxu2 %v375_v26  ;;  %v358_v26 = vld [vmem:[%s4150_s0 + $0x99] sm:$0xff] }
  0xac   :  { %v379_v31 = vpack.c.bf16 %v358_v26, %v357_v25 }
  0xad   :  { %v3541_v33 = vpop.f32.mrf.mxu1 }
  0xae   :  { %v3539_v32 = vpop.f32.mrf.mxu2 }
  0xaf   :  { %v478_v35 = vpop.f32.mrf.mxu0 }
  0xb5   :  { %v3557_v42 = vpop.f32.mrf.mxu1 }
  0xb6   :  { %v3555_v39 = vpop.f32.mrf.mxu2 }
  0xb7   :  { %v481_v49 = vpop.f32.mrf.mxu0 }
  0xb8   :  { %632 = vmatmul.bf16.gmra.mxu1 %v286_v40 }
  0xbb   :  { %781 = vmatmul.bf16.gmra.mxu2 %v376_v41  ;;  %v3056_v41 = vld [vmem:[#allocation3 + $0x150] sm:$0xff] }
  0xbc   :  { %1489 = vmatpush.bf16.msra.mxu1 %v3056_v41  ;;  %v3055_v41 = vld [vmem:[#allocation3 + $0x148] sm:$0xff] }
  0xbd   :  { %v3567_v50 = vpop.f32.mrf.mxu1 }
  0xbe   :  { %v3565_v48 = vpop.f32.mrf.mxu2 }
  0xbf   :  { %v483_v7 = vpop.f32.mrf.mxu0 }
  0xc0   :  { %1490 = vmatpush.bf16.msra.mxu1 %v3055_v41 }
  0xc5   :  { %v3583_v60 = vpop.f32.mrf.mxu1 }
  0xc6   :  { %v3581_v57 = vpop.f32.mrf.mxu2 }
  0xc7   :  { %v486_v28 = vpop.f32.mrf.mxu0 }
  0xc8   :  { %637 = vmatmul.bf16.gmra.mxu1 %v287_v58 }
  0xcb   :  { %786 = vmatmul.bf16.gmra.mxu2 %v377_v59 }
  0xcd   :  { %v3593_v4 = vpop.f32.mrf.mxu1 }
  0xce   :  { %v3591_v3 = vpop.f32.mrf.mxu2 }
  0xd5   :  { %v3609_v15 = vpop.f32.mrf.mxu1 }
  0xd6   :  { %v3607_v11 = vpop.f32.mrf.mxu2 }
  0xd8   :  { %642 = vmatmul.bf16.gmra.mxu1 %v288_v12 }
  0xdb   :  { %791 = vmatmul.bf16.gmra.mxu2 %v378_v13 }
  0xdd   :  { %v3613_v21 = vpop.f32.mrf.mxu1 }
  0xde   :  { %v3611_v19 = vpop.f32.mrf.mxu2 }
  0xe5   :  { %v608_v34 = vpop.f32.mrf.mxu1 }
  0xe6   :  { %v3627_v29 = vpop.f32.mrf.mxu2  ;;  %v609_v36 = vadd.f32 %v608_v34, %v476_v20  ;;  %v271_v20 = vld [vmem:[%s4150_s0 + $0xaf] sm:$0xff] }
  0xe8   :  { %647 = vmatmul.bf16.gmra.mxu1 %v289_v30 }
  0xeb   :  { %796 = vmatmul.bf16.gmra.mxu2 %v379_v31 }
  0xed   :  { %v610_v46 = vpop.f32.mrf.mxu1 }
  0xee   :  { %v757_v38 = vpop.f32.mrf.mxu2  ;;  %v611_v58 = vadd.f32 %v610_v46, %v478_v35  ;;  %v3671_v46 = vpop.permute.xlu1 %118 }
  0xef   :  { %v832_v40 = vadd.f32 %v757_v38, %v609_v36  ;;  %v291_v38 = vpack.c.bf16 %v272_v22, %v271_v20  ;;  %v3084_v20 = vld [vmem:[#allocation3 + $0x230] sm:$0xff] }
  0xf0   :  { %2222 = vmatpush.bf16.msra.mxu0 %v3084_v20 }
  0xf1   :  { %v866_v47 = vadd.f32 %v3632_v37, %v832_v40  ;;  %v381_v40 = vpack.c.bf16 %v362_v24, %v361_v23  ;;  %v3691_v24 = vpop.permute.xlu2 %128 }
  0xf3   :  { %v896_v51 = vmul.f32 %v866_v47, %v3634_v45 }
  0xf5   :  { %v926_v56 = vmax.f32 %v896_v51, 0.0  ;;  %v613_v1 = vpop.f32.mrf.mxu1 }
  0xf6   :  { %v759_v59 = vpop.f32.mrf.mxu2  ;;  %v614_v9 = vadd.f32 %v613_v1, %v481_v49  ;;  %v274_v1 = vld [vmem:[%s4150_s0 + $0xc7] sm:$0xff] }
  0xf7   :  { %956 = vst [vmem:[#allocation2 + $0x10] sm:$0xff] %v926_v56  ;;  %v833_v61 = vadd.f32 %v759_v59, %v611_v58  ;;  %v3068_v58 = vld [vmem:[#allocation3 + $0x1b0] sm:$0xff]  ;;  %v488_v59 = vpop.f32.mrf.mxu0 }
  0xf8   :  { %652 = vmatmul.bf16.gmra.mxu1 %v290_v62  ;;  %2073 = vmatpush.bf16.msra.mxu3 %v3068_v58 }
  0xf9   :  { %v867_v2 = vadd.f32 %v3632_v37, %v833_v61 }
  0xfb   :  { %v897_v6 = vmul.f32 %v867_v2, %v3651_v5  ;;  %801 = vmatmul.bf16.gmra.mxu2 %v380_v63  ;;  %v363_v2 = vld [vmem:[%s4150_s0 + $0xc1] sm:$0xff] }
  0xfd   :  { %v927_v8 = vmax.f32 %v897_v6, 0.0  ;;  %v615_v16 = vpop.f32.mrf.mxu1  ;;  %v364_v6 = vld [vmem:[%s4150_s0 + $0xc9] sm:$0xff] }
  0xfe   :  { %v762_v10 = vpop.f32.mrf.mxu2  ;;  %v616_v26 = vadd.f32 %v615_v16, %v483_v7  ;;  %v986_v31 = vld [vmem:[#allocation2 + $0xf] sm:$0xff] }
  0xff   :  { %957 = vst [vmem:[#allocation2 + $0x18] sm:$0xff] %v927_v8  ;;  %v834_v12 = vadd.f32 %v762_v10, %v614_v9  ;;  %v1061_v13 = vpack.c.bf16 %v927_v8, %v926_v56  ;;  %v3076_v56 = vld [vmem:[#allocation3 + $0x1f0] sm:$0xff] }
 0x100   :  { %1941 = vmatpush.bf16.msra.mxu2 %v3076_v56 }
 0x101   :  { %v868_v17 = vadd.f32 %v3632_v37, %v834_v12  ;;  %1211 = vmatmul.bf16.vlgmr.msrb.gmra.mxu3 %v1061_v13 }
 0x103   :  { %v898_v18 = vmul.f32 %v868_v17, %v3654_v14  ;;  %v292_v17 = vpack.c.bf16 %v274_v1, %v273_v0  ;;  %v3054_v0 = vld [vmem:[#allocation3 + $0x140] sm:$0xff]  ;;  %v3075_v1 = vld [vmem:[#allocation3 + $0x1e8] sm:$0xff] }
 0x104   :  { %1491 = vmatpush.bf16.msra.mxu1 %v3054_v0  ;;  %1942 = vmatpush.bf16.msra.mxu2 %v3075_v1  ;;  %v279_v1 = vld [vmem:[%s4150_s0 + $0xef] sm:$0xff] }
 0x105   :  { %v928_v25 = vmax.f32 %v898_v18, 0.0  ;;  %v618_v43 = vpop.f32.mrf.mxu1  ;;  %v382_v18 = vpack.c.bf16 %v364_v6, %v363_v2  ;;  %v3067_v2 = vld [vmem:[#allocation3 + $0x1a8] sm:$0xff] }
 0x106   :  { %v764_v30 = vpop.f32.mrf.mxu2  ;;  %v987_v34 = vld [vmem:[#allocation2 + $0x17] sm:$0xff]  ;;  %v619_v51 = vadd.f32 %v618_v43, %v486_v28  ;;  %v275_v43 = vld [vmem:[%s4150_s0 + $0xcf] sm:$0xff]  ;;  %2074 = vmatpush.bf16.msra.mxu3 %v3067_v2 }
 0x107   :  { %958 = vst [vmem:[#allocation2 + $0x20] sm:$0xff] %v928_v25  ;;  %v835_v35 = vadd.f32 %v764_v30, %v616_v26  ;;  %v1016_v36 = vpack.c.bf16 %v987_v34, %v986_v31  ;;  %v369_v2 = vld [vmem:[%s4150_s0 + $0xf1] sm:$0xff] }
 0x108   :  { %657 = vmatmul.bf16.gmra.mxu1 %v291_v38 }
 0x109   :  { %v869_v44 = vadd.f32 %v3632_v37, %v835_v35  ;;  %1343 = vmatmul.bf16.vlgmr.msrb.gmra.mxu0 %v1016_v36 }
 0x10b   :  { %v899_v47 = vmul.f32 %v869_v44, %v3671_v46  ;;  %806 = vmatmul.bf16.gmra.mxu2 %v381_v40  ;;  %v3695_v40 = vpop.permute.xlu0 %133 }
 0x10d   :  { %v929_v49 = vmax.f32 %v899_v47, 0.0  ;;  %v620_v61 = vpop.f32.mrf.mxu1  ;;  %v276_v47 = vld [vmem:[%s4150_s0 + $0xd7] sm:$0xff] }
 0x10e   :  { %v767_v52 = vpop.f32.mrf.mxu2  ;;  %v621_v8 = vadd.f32 %v620_v61, %v488_v59  ;;  %v988_v10 = vld [vmem:[#allocation2 + $0x1f] sm:$0xff] }
 0x10f   :  { %959 = vst [vmem:[#allocation2 + $0x28] sm:$0xff] %v929_v49  ;;  %v836_v54 = vadd.f32 %v767_v52, %v619_v51  ;;  %v1062_v55 = vpack.c.bf16 %v929_v49, %v928_v25  ;;  %v491_v25 = vpop.f32.mrf.mxu0  ;;  %v365_v49 = vld [vmem:[%s4150_s0 + $0xd1] sm:$0xff]  ;;  %v366_v51 = vld [vmem:[%s4150_s0 + $0xd9] sm:$0xff] }
 0x111   :  { %v870_v62 = vadd.f32 %v3632_v37, %v836_v54  ;;  %1216 = vmatmul.bf16.gmra.mxu3 %v1062_v55 }
 0x113   :  { %v900_v63 = vmul.f32 %v870_v62, %v3674_v53  ;;  %v293_v62 = vpack.c.bf16 %v276_v47, %v275_v43 }
 0x115   :  { %v930_v7 = vmax.f32 %v900_v63, 0.0  ;;  %v623_v22 = vpop.f32.mrf.mxu1  ;;  %v383_v63 = vpack.c.bf16 %v366_v51, %v365_v49 }
 0x116   :  { %v769_v9 = vpop.f32.mrf.mxu2  ;;  %v989_v12 = vld [vmem:[#allocation2 + $0x27] sm:$0xff]  ;;  %v624_v30 = vadd.f32 %v623_v22, %v491_v25 }
 0x117   :  { %960 = vst [vmem:[#allocation2 + $0x30] sm:$0xff] %v930_v7  ;;  %v837_v13 = vadd.f32 %v769_v9, %v621_v8  ;;  %v1017_v16 = vpack.c.bf16 %v989_v12, %v988_v10  ;;  %v493_v44 = vpop.f32.mrf.mxu0  ;;  %v3711_v8 = vpop.permute.xlu1 %138 }
 0x118   :  { %662 = vmatmul.bf16.gmra.mxu1 %v292_v17 }
 0x119   :  { %v871_v23 = vadd.f32 %v3632_v37, %v837_v13  ;;  %1348 = vmatmul.bf16.gmra.mxu0 %v1017_v16 }
 0x11b   :  { %v901_v26 = vmul.f32 %v871_v23, %v3691_v24  ;;  %811 = vmatmul.bf16.gmra.mxu2 %v382_v18  ;;  %v3083_v18 = vld [vmem:[#allocation3 + $0x228] sm:$0xff]  ;;  %v3716_v23 = vpop.permute.xlu2 %143 }
 0x11c   :  { %2223 = vmatpush.bf16.msra.mxu0 %v3083_v18 }
 0x11d   :  { %v931_v28 = vmax.f32 %v901_v26, 0.0  ;;  %v625_v36 = vpop.f32.mrf.mxu1  ;;  %v277_v26 = vld [vmem:[%s4150_s0 + $0xdf] sm:$0xff] }
 0x11e   :  { %v772_v31 = vpop.f32.mrf.mxu2  ;;  %v626_v54 = vadd.f32 %v625_v36, %v493_v44  ;;  %v990_v56 = vld [vmem:[#allocation2 + $0x2f] sm:$0xff] }
 0x11f   :  { %961 = vst [vmem:[#allocation2 + $0x38] sm:$0xff] %v931_v28  ;;  %v838_v34 = vadd.f32 %v772_v31, %v624_v30  ;;  %v1063_v35 = vpack.c.bf16 %v931_v28, %v930_v7  ;;  %v367_v28 = vld [vmem:[%s4150_s0 + $0xe1] sm:$0xff]  ;;  %v368_v30 = vld [vmem:[%s4150_s0 + $0xe9] sm:$0xff] }
 0x120   :  { %v384_v47 = vpack.c.bf16 %v368_v30, %v367_v28  ;;  %v3757_v30 = vpop.f32.mrf.mxu3 }
 0x121   :  { %v872_v38 = vadd.f32 %v3632_v37, %v838_v34  ;;  %1221 = vmatmul.bf16.gmra.mxu3 %v1063_v35 }
 0x123   :  { %v902_v41 = vmul.f32 %v872_v38, %v3695_v40  ;;  %v3755_v28 = vpop.permute.xlu2 %158 }
 0x125   :  { %v932_v52 = vmax.f32 %v902_v41, 0.0  ;;  %v628_v6 = vpop.f32.mrf.mxu1 }
 0x126   :  { %v774_v55 = vpop.f32.mrf.mxu2  ;;  %v991_v58 = vld [vmem:[#allocation2 + $0x37] sm:$0xff]  ;;  %v629_v12 = vadd.f32 %v628_v6, %v3531_v27  ;;  %v278_v27 = vld [vmem:[%s4150_s0 + $0xe7] sm:$0xff] }
 0x127   :  { %962 = vst [vmem:[#allocation2 + $0x40] sm:$0xff] %v932_v52  ;;  %v839_v59 = vadd.f32 %v774_v55, %v626_v54  ;;  %v1018_v61 = vpack.c.bf16 %v991_v58, %v990_v56  ;;  %v294_v44 = vpack.c.bf16 %v278_v27, %v277_v26  ;;  %v370_v6 = vld [vmem:[%s4150_s0 + $0xf9] sm:$0xff] }
 0x128   :  { %667 = vmatmul.bf16.gmra.mxu1 %v293_v62 }
 0x129   :  { %v873_v7 = vadd.f32 %v3632_v37, %v839_v59  ;;  %1353 = vmatmul.bf16.gmra.mxu0 %v1018_v61 }
 0x12b   :  { %v903_v9 = vmul.f32 %v873_v7, %v3711_v8  ;;  %816 = vmatmul.bf16.gmra.mxu2 %v383_v63  ;;  %v3738_v63 = vpop.permute.xlu1 %153 }
 0x12d   :  { %v933_v10 = vmax.f32 %v903_v9, 0.0  ;;  %v630_v20 = vpop.f32.mrf.mxu1 }
 0x12e   :  { %v777_v13 = vpop.f32.mrf.mxu2  ;;  %v631_v34 = vadd.f32 %v630_v20, %v3541_v33  ;;  %v992_v36 = vld [vmem:[#allocation2 + $0x3f] sm:$0xff]  ;;  %v385_v20 = vpack.c.bf16 %v370_v6, %v369_v2 }
 0x12f   :  { %963 = vst [vmem:[#allocation2 + $0x48] sm:$0xff] %v933_v10  ;;  %v840_v16 = vadd.f32 %v777_v13, %v629_v12  ;;  %v1064_v17 = vpack.c.bf16 %v933_v10, %v932_v52  ;;  %v3733_v52 = vpop.permute.xlu0 %148 }
 0x131   :  { %v874_v22 = vadd.f32 %v3632_v37, %v840_v16  ;;  %1226 = vmatmul.bf16.gmra.mxu3 %v1064_v17 }
 0x133   :  { %v904_v25 = vmul.f32 %v874_v22, %v3716_v23  ;;  %v3074_v22 = vld [vmem:[#allocation3 + $0x1e0] sm:$0xff]  ;;  %v3769_v2 = vpop.permute.xlu1 %168 }
 0x134   :  { %1943 = vmatpush.bf16.msra.mxu2 %v3074_v22 }
 0x135   :  { %v934_v31 = vmax.f32 %v904_v25, 0.0  ;;  %v633_v49 = vpop.f32.mrf.mxu1  ;;  %v3066_v25 = vld [vmem:[#allocation3 + $0x1a0] sm:$0xff] }
 0x136   :  { %v779_v35 = vpop.f32.mrf.mxu2  ;;  %v993_v38 = vld [vmem:[#allocation2 + $0x47] sm:$0xff]  ;;  %v634_v33 = vadd.f32 %v633_v49, %v3557_v42  ;;  %v280_v42 = vld [vmem:[%s4150_s0 + $0xf7] sm:$0xff]  ;;  %2075 = vmatpush.bf16.msra.mxu3 %v3066_v25 }
 0x137   :  { %964 = vst [vmem:[#allocation2 + $0x50] sm:$0xff] %v934_v31  ;;  %v841_v41 = vadd.f32 %v779_v35, %v631_v34  ;;  %v1019_v43 = vpack.c.bf16 %v993_v38, %v992_v36  ;;  %v295_v18 = vpack.c.bf16 %v280_v42, %v279_v1 }
 0x138   :  { %672 = vmatmul.bf16.gmra.mxu1 %v294_v44 }
 0x139   :  { %v875_v51 = vadd.f32 %v3632_v37, %v841_v41  ;;  %1358 = vmatmul.bf16.gmra.mxu0 %v1019_v43  ;;  %v3082_v41 = vld [vmem:[#allocation3 + $0x220] sm:$0xff] }
 0x13a   :  { %2224 = vmatpush.bf16.msra.mxu0 %v3082_v41  ;;  %v1078_v41 = vld [vmem:[#allocation2 + $0x21] sm:$0xff] }
 0x13b   :  { %v905_v54 = vmul.f32 %v875_v51, %v3733_v52  ;;  %821 = vmatmul.bf16.gmra.mxu2 %v384_v47  ;;  %v3762_v47 = vpop.permute.xlu0 %163  ;;  %v3765_v51 = vpop.f32.mrf.mxu3 }
 0x13d   :  { %v935_v55 = vmax.f32 %v905_v54, 0.0  ;;  %v635_v61 = vpop.f32.mrf.mxu1 }
 0x13e   :  { %v782_v56 = vpop.f32.mrf.mxu2  ;;  %v636_v9 = vadd.f32 %v635_v61, %v3567_v50  ;;  %v994_v12 = vld [vmem:[#allocation2 + $0x4f] sm:$0xff] }
 0x13f   :  { %965 = vst [vmem:[#allocation2 + $0x58] sm:$0xff] %v935_v55  ;;  %v842_v58 = vadd.f32 %v782_v56, %v634_v33  ;;  %v1065_v59 = vpack.c.bf16 %v935_v55, %v934_v31 }
 0x141   :  { %v876_v62 = vadd.f32 %v3632_v37, %v842_v58  ;;  %1231 = vmatmul.bf16.gmra.mxu3 %v1065_v59  ;;  %v1077_v58 = vld [vmem:[#allocation2 + $0x19] sm:$0xff] }
 0x143   :  { %v906_v0 = vmul.f32 %v876_v62, %v3738_v63 }
 0x145   :  { %v936_v7 = vmax.f32 %v906_v0, 0.0  ;;  %v638_v26 = vpop.f32.mrf.mxu1  ;;  %v1076_v0 = vld [vmem:[#allocation2 + $0x11] sm:$0xff] }
 0x146   :  { %v784_v10 = vpop.f32.mrf.mxu2  ;;  %v995_v13 = vld [vmem:[#allocation2 + $0x57] sm:$0xff]  ;;  %v639_v34 = vadd.f32 %v638_v26, %v3583_v60  ;;  %v1106_v42 = vpack.c.bf16 %v1077_v58, %v1076_v0  ;;  %v3788_v0 = vpop.permute.xlu1 %183 }
 0x147   :  { %966 = vst [vmem:[#allocation2 + $0x60] sm:$0xff] %v936_v7  ;;  %v843_v16 = vadd.f32 %v784_v10, %v636_v9  ;;  %v1020_v17 = vpack.c.bf16 %v995_v13, %v994_v12  ;;  %v3773_v10 = vpop.f32.mrf.mxu3 }
 0x148   :  { %677 = vmatmul.bf16.gmra.mxu1 %v295_v18  ;;  %v3776_v18 = vpop.permute.xlu2 %173 }
 0x149   :  { %v877_v27 = vadd.f32 %v3632_v37, %v843_v16  ;;  %1363 = vmatmul.bf16.gmra.mxu0 %v1020_v17 }
 0x14b   :  { %v907_v50 = vmul.f32 %v877_v27, %v3755_v28  ;;  %826 = vmatmul.bf16.gmra.mxu2 %v385_v20 }
 0x14d   :  { %v937_v31 = vmax.f32 %v907_v50, 0.0  ;;  %v640_v43 = vpop.f32.mrf.mxu1  ;;  %v1079_v50 = vld [vmem:[#allocation2 + $0x29] sm:$0xff] }
 0x14e   :  { %v787_v35 = vpop.f32.mrf.mxu2  ;;  %v641_v55 = vadd.f32 %v640_v43, %v3593_v4  ;;  %v996_v33 = vld [vmem:[#allocation2 + $0x5f] sm:$0xff] }
 0x14f   :  { %967 = vst [vmem:[#allocation2 + $0x68] sm:$0xff] %v937_v31  ;;  %v844_v36 = vadd.f32 %v787_v35, %v639_v34  ;;  %v1066_v38 = vpack.c.bf16 %v937_v31, %v936_v7  ;;  %v3073_v35 = vld [vmem:[#allocation3 + $0x1d8] sm:$0xff]  ;;  %v3780_v43 = vpop.f32.mrf.mxu3 }
 0x150   :  { %1944 = vmatpush.bf16.msra.mxu2 %v3073_v35 }
 0x151   :  { %v878_v44 = vadd.f32 %v3632_v37, %v844_v36  ;;  %1236 = vmatmul.bf16.gmra.mxu3 %v1066_v38  ;;  %v3065_v36 = vld [vmem:[#allocation3 + $0x198] sm:$0xff] }
 0x152   :  { %2076 = vmatpush.bf16.msra.mxu3 %v3065_v36 }
 0x153   :  { %v908_v49 = vmul.f32 %v878_v44, %v3762_v47 }
 0x155   :  { %v938_v54 = vmax.f32 %v908_v49, 0.0  ;;  %v643_v62 = vpop.f32.mrf.mxu1  ;;  %v1107_v49 = vpack.c.bf16 %v1079_v50, %v1078_v41 }
 0x156   :  { %v789_v60 = vpop.f32.mrf.mxu2  ;;  %v997_v56 = vld [vmem:[#allocation2 + $0x67] sm:$0xff]  ;;  %v644_v4 = vadd.f32 %v643_v62, %v3609_v15 }
 0x157   :  { %968 = vst [vmem:[#allocation2 + $0x70] sm:$0xff] %v938_v54  ;;  %v845_v59 = vadd.f32 %v789_v60, %v641_v55  ;;  %v1021_v61 = vpack.c.bf16 %v997_v56, %v996_v33 }
 0x158   :  { %1492 = vmatmul.bf16.vlgmr.msra.gmra.mxu1 %v1106_v42 }
 0x159   :  { %v879_v1 = vadd.f32 %v3632_v37, %v845_v59  ;;  %1368 = vmatmul.bf16.gmra.mxu0 %v1021_v61  ;;  %v3081_v59 = vld [vmem:[#allocation3 + $0x218] sm:$0xff] }
 0x15a   :  { %2225 = vmatpush.bf16.msra.mxu0 %v3081_v59 }
 0x15b   :  { %v909_v6 = vmul.f32 %v879_v1, %v3769_v2  ;;  %v3790_v1 = vpop.f32.mrf.mxu3 }
 0x15d   :  { %v939_v7 = vmax.f32 %v909_v6, 0.0  ;;  %v645_v16 = vpop.f32.mrf.mxu1 }
 0x15e   :  { %v792_v9 = vpop.f32.mrf.mxu2  ;;  %v646_v25 = vadd.f32 %v645_v16, %v3613_v21  ;;  %v998_v27 = vld [vmem:[#allocation2 + $0x6f] sm:$0xff] }
 0x15f   :  { %969 = vst [vmem:[#allocation2 + $0x78] sm:$0xff] %v939_v7  ;;  %v846_v12 = vadd.f32 %v792_v9, %v644_v4  ;;  %v1067_v13 = vpack.c.bf16 %v939_v7, %v938_v54  ;;  %v3783_v54 = vpop.permute.xlu0 %178 }
 0x161   :  { %v880_v17 = vadd.f32 %v3632_v37, %v846_v12  ;;  %1241 = vmatmul.bf16.gmra.mxu3 %v1067_v13  ;;  %v1081_v12 = vld [vmem:[#allocation2 + $0x39] sm:$0xff] }
 0x163   :  { %v910_v20 = vmul.f32 %v880_v17, %v3776_v18 }
 0x165   :  { %v940_v22 = vmax.f32 %v910_v20, 0.0  ;;  %v648_v38 = vpop.f32.mrf.mxu1  ;;  %v1080_v20 = vld [vmem:[#allocation2 + $0x31] sm:$0xff] }
 0x166   :  { %v794_v26 = vpop.f32.mrf.mxu2  ;;  %v999_v15 = vld [vmem:[#allocation2 + $0x77] sm:$0xff]  ;;  %v649_v60 = vadd.f32 %v648_v38, %v3539_v32 }
 0x167   :  { %970 = vst [vmem:[#allocation2 + $0x80] sm:$0xff] %v940_v22  ;;  %v847_v31 = vadd.f32 %v794_v26, %v646_v25  ;;  %v1022_v34 = vpack.c.bf16 %v999_v15, %v998_v27  ;;  %v1108_v25 = vpack.c.bf16 %v1081_v12, %v1080_v20  ;;  %v3795_v26 = vpop.permute.xlu2 %188  ;;  %v3798_v15 = vpop.f32.mrf.mxu3 }
 0x168   :  { %1497 = vmatmul.bf16.gmra.mxu1 %v1107_v49  ;;  %v3802_v41 = vpop.permute.xlu0 %193 }
 0x169   :  { %v881_v44 = vadd.f32 %v3632_v37, %v847_v31  ;;  %1373 = vmatmul.bf16.gmra.mxu0 %v1022_v34 }
 0x16b   :  { %v911_v21 = vmul.f32 %v881_v44, %v3783_v54 }
 0x16d   :  { %v941_v55 = vmax.f32 %v911_v21, 0.0  ;;  %v650_v61 = vpop.f32.mrf.mxu1 }
 0x16e   :  { %v797_v33 = vpop.f32.mrf.mxu2  ;;  %v651_v7 = vadd.f32 %v650_v61, %v3555_v39  ;;  %v1000_v4 = vld [vmem:[#allocation2 + $0x7f] sm:$0xff] }
 0x16f   :  { %971 = vst [vmem:[#allocation2 + $0x88] sm:$0xff] %v941_v55  ;;  %v848_v56 = vadd.f32 %v797_v33, %v649_v60  ;;  %v1068_v58 = vpack.c.bf16 %v941_v55, %v940_v22 }
 0x171   :  { %v882_v62 = vadd.f32 %v3632_v37, %v848_v56  ;;  %1246 = vmatmul.bf16.gmra.mxu3 %v1068_v58  ;;  %v1083_v58 = vld [vmem:[#allocation2 + $0x49] sm:$0xff] }
 0x173   :  { %v912_v42 = vmul.f32 %v882_v62, %v3788_v0 }
 0x175   :  { %v942_v6 = vmax.f32 %v912_v42, 0.0  ;;  %v653_v17 = vpop.f32.mrf.mxu1  ;;  %v3072_v42 = vld [vmem:[#allocation3 + $0x1d0] sm:$0xff] }
 0x176   :  { %v799_v32 = vpop.f32.mrf.mxu2  ;;  %v1001_v9 = vld [vmem:[#allocation2 + $0x87] sm:$0xff]  ;;  %v654_v50 = vadd.f32 %v653_v17, %v3565_v48  ;;  %1945 = vmatpush.bf16.msra.mxu2 %v3072_v42 }
 0x177   :  { %972 = vst [vmem:[#allocation2 + $0x90] sm:$0xff] %v942_v6  ;;  %v849_v13 = vadd.f32 %v799_v32, %v651_v7  ;;  %v1023_v16 = vpack.c.bf16 %v1001_v9, %v1000_v4  ;;  %v1082_v32 = vld [vmem:[#allocation2 + $0x41] sm:$0xff] }
 0x178   :  { %1502 = vmatmul.bf16.gmra.mxu1 %v1108_v25  ;;  %v1109_v9 = vpack.c.bf16 %v1083_v58, %v1082_v32 }
 0x179   :  { %v883_v22 = vadd.f32 %v3632_v37, %v849_v13  ;;  %1378 = vmatmul.bf16.gmra.mxu0 %v1023_v16 }
 0x17b   :  { %v913_v27 = vmul.f32 %v883_v22, %v3795_v26 }
 0x17d   :  { %v943_v39 = vmax.f32 %v913_v27, 0.0  ;;  %v655_v36 = vpop.f32.mrf.mxu1 }
 0x17e   :  { %v802_v31 = vpop.f32.mrf.mxu2  ;;  %v656_v55 = vadd.f32 %v655_v36, %v3581_v57  ;;  %v1002_v56 = vld [vmem:[#allocation2 + $0x8f] sm:$0xff]  ;;  %v3809_v57 = vpop.permute.xlu1 %198 }
 0x17f   :  { %973 = vst [vmem:[#allocation2 + $0x98] sm:$0xff] %v943_v39  ;;  %v850_v34 = vadd.f32 %v802_v31, %v654_v50  ;;  %v1069_v35 = vpack.c.bf16 %v943_v39, %v942_v6  ;;  %v3064_v6 = vld [vmem:[#allocation3 + $0x190] sm:$0xff] }
 0x180   :  { %2077 = vmatpush.bf16.msra.mxu3 %v3064_v6  ;;  %v3080_v50 = vld [vmem:[#allocation3 + $0x210] sm:$0xff] }
 0x181   :  { %v884_v38 = vadd.f32 %v3632_v37, %v850_v34  ;;  %1251 = vmatmul.bf16.gmra.mxu3 %v1069_v35  ;;  %2226 = vmatpush.bf16.msra.mxu0 %v3080_v50  ;;  %v3816_v35 = vpop.permute.xlu2 %203 }
 0x183   :  { %v914_v44 = vmul.f32 %v884_v38, %v3802_v41 }
 0x184   :  { %v1212_v49 = vpop.f32.mrf.mxu3 }
 0x185   :  { %v944_v21 = vmax.f32 %v914_v44, 0.0  ;;  %v658_v7 = vpop.f32.mrf.mxu1 }
 0x186   :  { %v804_v60 = vpop.f32.mrf.mxu2  ;;  %v1344_v33 = vpop.f32.mrf.mxu0  ;;  %v1003_v48 = vld [vmem:[#allocation2 + $0x97] sm:$0xff]  ;;  %v659_v17 = vadd.f32 %v658_v7, %v3591_v3 }
 0x187   :  { %974 = vst [vmem:[#allocation2 + $0xa0] sm:$0xff] %v944_v21  ;;  %v851_v59 = vadd.f32 %v804_v60, %v656_v55  ;;  %v1024_v61 = vpack.c.bf16 %v1003_v48, %v1002_v56  ;;  %v3806_v62 = vadd.f32 %v1344_v33, %v1212_v49  ;;  %v1085_v56 = vld [vmem:[#allocation2 + $0x59] sm:$0xff]  ;;  %v3823_v7 = vpop.permute.xlu0 %208 }
 0x188   :  { %1507 = vmatmul.bf16.gmra.mxu1 %v1109_v9 }
 0x189   :  { %v885_v4 = vadd.f32 %v3632_v37, %v851_v59  ;;  %1383 = vmatmul.bf16.gmra.mxu0 %v1024_v61  ;;  %v1084_v61 = vld [vmem:[#allocation2 + $0x51] sm:$0xff] }
 0x18a   :  { %v1110_v6 = vpack.c.bf16 %v1085_v56, %v1084_v61  ;;  %v1086_v61 = vld [vmem:[#allocation2 + $0x61] sm:$0xff] }
 0x18b   :  { %v915_v12 = vmul.f32 %v885_v4, %v3809_v57 }
 0x18c   :  { %v1214_v13 = vpop.f32.mrf.mxu3 }
 0x18d   :  { %v945_v16 = vmax.f32 %v915_v12, 0.0  ;;  %v660_v31 = vpop.f32.mrf.mxu1 }
 0x18e   :  { %v807_v20 = vpop.f32.mrf.mxu2  ;;  %v1346_v22 = vpop.f32.mrf.mxu0  ;;  %v661_v3 = vadd.f32 %v660_v31, %v3607_v11  ;;  %v1004_v60 = vld [vmem:[#allocation2 + $0x9f] sm:$0xff] }
 0x18f   :  { %975 = vst [vmem:[#allocation2 + $0xa8] sm:$0xff] %v945_v16  ;;  %v852_v25 = vadd.f32 %v807_v20, %v659_v17  ;;  %v3813_v27 = vadd.f32 %v1346_v22, %v1214_v13  ;;  %v1070_v39 = vpack.c.bf16 %v945_v16, %v944_v21  ;;  %v3071_v22 = vld [vmem:[#allocation3 + $0x1c8] sm:$0xff]  ;;  %v3830_v31 = vpop.permute.xlu1 %213 }
 0x190   :  { %1946 = vmatpush.bf16.msra.mxu2 %v3071_v22 }
 0x191   :  { %v886_v34 = vadd.f32 %v3632_v37, %v852_v25  ;;  %1256 = vmatmul.bf16.gmra.mxu3 %v1070_v39  ;;  %v3063_v25 = vld [vmem:[#allocation3 + $0x188] sm:$0xff] }
 0x192   :  { %2078 = vmatpush.bf16.msra.mxu3 %v3063_v25 }
 0x193   :  { %v916_v36 = vmul.f32 %v886_v34, %v3816_v35 }
 0x194   :  { %v1217_v38 = vpop.f32.mrf.mxu3 }
 0x195   :  { %v946_v44 = vmax.f32 %v916_v36, 0.0  ;;  %v663_v59 = vpop.f32.mrf.mxu1 }
 0x196   :  { %v809_v49 = vpop.f32.mrf.mxu2  ;;  %v1349_v55 = vpop.f32.mrf.mxu0  ;;  %v1005_v33 = vld [vmem:[#allocation2 + $0xa7] sm:$0xff]  ;;  %v664_v9 = vadd.f32 %v663_v59, %v3611_v19 }
 0x197   :  { %976 = vst [vmem:[#allocation2 + $0xb0] sm:$0xff] %v946_v44  ;;  %v853_v21 = vadd.f32 %v809_v49, %v661_v3  ;;  %v1025_v48 = vpack.c.bf16 %v1005_v33, %v1004_v60  ;;  %v3820_v58 = vadd.f32 %v1349_v55, %v1217_v38  ;;  %v1087_v60 = vld [vmem:[#allocation2 + $0x69] sm:$0xff] }
 0x198   :  { %1512 = vmatmul.bf16.gmra.mxu1 %v1110_v6  ;;  %v1111_v6 = vpack.c.bf16 %v1087_v60, %v1086_v61  ;;  %v1089_v60 = vld [vmem:[#allocation2 + $0x79] sm:$0xff] }
 0x199   :  { %v887_v42 = vadd.f32 %v3632_v37, %v853_v21  ;;  %1388 = vmatmul.bf16.gmra.mxu0 %v1025_v48  ;;  %v3079_v48 = vld [vmem:[#allocation3 + $0x208] sm:$0xff] }
 0x19a   :  { %2227 = vmatpush.bf16.msra.mxu0 %v3079_v48 }
 0x19b   :  { %v917_v11 = vmul.f32 %v887_v42, %v3823_v7 }
 0x19c   :  { %v1219_v32 = vpop.f32.mrf.mxu3 }
 0x19d   :  { %v947_v4 = vmax.f32 %v917_v11, 0.0  ;;  %v665_v39 = vpop.f32.mrf.mxu1  ;;  %v3837_v11 = vpop.permute.xlu2 %218 }
 0x19e   :  { %v812_v12 = vpop.f32.mrf.mxu2  ;;  %v1351_v13 = vpop.f32.mrf.mxu0  ;;  %v666_v38 = vadd.f32 %v665_v39, %v3627_v29  ;;  %v1006_v55 = vld [vmem:[#allocation2 + $0xaf] sm:$0xff] }
 0x19f   :  { %977 = vst [vmem:[#allocation2 + $0xb8] sm:$0xff] %v947_v4  ;;  %v854_v16 = vadd.f32 %v812_v12, %v664_v9  ;;  %v3827_v17 = vadd.f32 %v1351_v13, %v1219_v32  ;;  %v1071_v20 = vpack.c.bf16 %v947_v4, %v946_v44 }
 0x1a1   :  { %v888_v50 = vadd.f32 %v3632_v37, %v854_v16  ;;  %1261 = vmatmul.bf16.gmra.mxu3 %v1071_v20 }
 0x1a3   :  { %v918_v34 = vmul.f32 %v888_v50, %v3830_v31  ;;  %v3844_v50 = vpop.permute.xlu0 %223 }
 0x1a4   :  { %v1222_v19 = vpop.f32.mrf.mxu3 }
 0x1a5   :  { %v948_v36 = vmax.f32 %v918_v34, 0.0  ;;  %v668_v59 = vpop.f32.mrf.mxu1 }
 0x1a6   :  { %v814_v3 = vpop.f32.mrf.mxu2  ;;  %v1354_v49 = vpop.f32.mrf.mxu0  ;;  %v1007_v44 = vld [vmem:[#allocation2 + $0xb7] sm:$0xff]  ;;  %v669_v9 = vadd.f32 %v668_v59, %v3757_v30 }
 0x1a7   :  { %978 = vst [vmem:[#allocation2 + $0xc0] sm:$0xff] %v948_v36  ;;  %v855_v33 = vadd.f32 %v814_v3, %v666_v38  ;;  %v1026_v56 = vpack.c.bf16 %v1007_v44, %v1006_v55  ;;  %v3834_v21 = vadd.f32 %v1354_v49, %v1222_v19  ;;  %v1088_v59 = vld [vmem:[#allocation2 + $0x71] sm:$0xff] }
 0x1a8   :  { %1517 = vmatmul.bf16.gmra.mxu1 %v1111_v6  ;;  %v3851_v6 = vpop.permute.xlu1 %228 }
 0x1a9   :  { %v889_v42 = vadd.f32 %v3632_v37, %v855_v33  ;;  %1393 = vmatmul.bf16.gmra.mxu0 %v1026_v56 }
 0x1ab   :  { %v919_v29 = vmul.f32 %v889_v42, %v3837_v11  ;;  %v1112_v42 = vpack.c.bf16 %v1089_v60, %v1088_v59 }
 0x1ac   :  { %v1224_v32 = vpop.f32.mrf.mxu3 }
 0x1ad   :  { %v949_v4 = vmax.f32 %v919_v29, 0.0  ;;  %v670_v25 = vpop.f32.mrf.mxu1 }
 0x1ae   :  { %v817_v12 = vpop.f32.mrf.mxu2  ;;  %v1356_v13 = vpop.f32.mrf.mxu0  ;;  %v671_v3 = vadd.f32 %v670_v25, %v3765_v51  ;;  %v1008_v55 = vld [vmem:[#allocation2 + $0xbf] sm:$0xff] }
 0x1af   :  { %979 = vst [vmem:[#allocation2 + $0xc8] sm:$0xff] %v949_v4  ;;  %v856_v16 = vadd.f32 %v817_v12, %v669_v9  ;;  %v3841_v20 = vadd.f32 %v1356_v13, %v1224_v32  ;;  %v1072_v22 = vpack.c.bf16 %v949_v4, %v948_v36 }
 0x1b1   :  { %v890_v39 = vadd.f32 %v3632_v37, %v856_v16  ;;  %1266 = vmatmul.bf16.gmra.mxu3 %v1072_v22 }
 0x1b3   :  { %v920_v34 = vmul.f32 %v890_v39, %v3844_v50 }
 0x1b4   :  { %v1227_v19 = vpop.f32.mrf.mxu3 }
 0x1b5   :  { %v950_v38 = vmax.f32 %v920_v34, 0.0  ;;  %v673_v48 = vpop.f32.mrf.mxu1  ;;  %v3070_v34 = vld [vmem:[#allocation3 + $0x1c0] sm:$0xff] }
 0x1b6   :  { %v819_v30 = vpop.f32.mrf.mxu2  ;;  %v1359_v49 = vpop.f32.mrf.mxu0  ;;  %v1009_v44 = vld [vmem:[#allocation2 + $0xc7] sm:$0xff]  ;;  %v674_v4 = vadd.f32 %v673_v48, %v3773_v10  ;;  %1947 = vmatpush.bf16.msra.mxu2 %v3070_v34 }
 0x1b7   :  { %980 = vst [vmem:[#allocation2 + $0xd0] sm:$0xff] %v950_v38  ;;  %v857_v33 = vadd.f32 %v819_v30, %v671_v3  ;;  %v1027_v36 = vpack.c.bf16 %v1009_v44, %v1008_v55  ;;  %v3848_v56 = vadd.f32 %v1359_v49, %v1227_v19  ;;  %v3062_v19 = vld [vmem:[#allocation3 + $0x180] sm:$0xff]  ;;  %v3858_v3 = vpop.permute.xlu2 %233 }
 0x1b8   :  { %1522 = vmatmul.bf16.gmra.mxu1 %v1112_v42  ;;  %2079 = vmatpush.bf16.msra.mxu3 %v3062_v19 }
 0x1b9   :  { %v891_v61 = vadd.f32 %v3632_v37, %v857_v33  ;;  %1398 = vmatmul.bf16.gmra.mxu0 %v1027_v36  ;;  %v1091_v36 = vld [vmem:[#allocation2 + $0x89] sm:$0xff] }
 0x1bb   :  { %v921_v51 = vmul.f32 %v891_v61, %v3851_v6 }
 0x1bc   :  { %v1229_v29 = vpop.f32.mrf.mxu3 }
 0x1bd   :  { %v951_v32 = vmax.f32 %v921_v51, 0.0  ;;  %v675_v25 = vpop.f32.mrf.mxu1  ;;  %v1090_v51 = vld [vmem:[#allocation2 + $0x81] sm:$0xff] }
 0x1be   :  { %v822_v9 = vpop.f32.mrf.mxu2  ;;  %v1361_v12 = vpop.f32.mrf.mxu0  ;;  %v676_v55 = vadd.f32 %v675_v25, %v3780_v43  ;;  %v1010_v33 = vld [vmem:[#allocation2 + $0xcf] sm:$0xff] }
 0x1bf   :  { %981 = vst [vmem:[#allocation2 + $0xd8] sm:$0xff] %v951_v32  ;;  %v858_v13 = vadd.f32 %v822_v9, %v674_v4  ;;  %v3855_v16 = vadd.f32 %v1361_v12, %v1229_v29  ;;  %v1073_v22 = vpack.c.bf16 %v951_v32, %v950_v38  ;;  %v1113_v32 = vpack.c.bf16 %v1091_v36, %v1090_v51  ;;  %v3078_v4 = vld [vmem:[#allocation3 + $0x200] sm:$0xff]  ;;  %v3865_v9 = vpop.permute.xlu0 %238  ;;  %v1093_v51 = vld [vmem:[#allocation2 + $0x99] sm:$0xff] }
 0x1c0   :  { %2228 = vmatpush.bf16.msra.mxu0 %v3078_v4 }
 0x1c1   :  { %v892_v39 = vadd.f32 %v3632_v37, %v858_v13  ;;  %1271 = vmatmul.bf16.gmra.mxu3 %v1073_v22 }
 0x1c3   :  { %v922_v30 = vmul.f32 %v892_v39, %v3858_v3 }
 0x1c4   :  { %v1232_v10 = vpop.f32.mrf.mxu3 }
 0x1c5   :  { %v952_v49 = vmax.f32 %v922_v30, 0.0  ;;  %v678_v42 = vpop.f32.mrf.mxu1 }
 0x1c6   :  { %v824_v44 = vpop.f32.mrf.mxu2  ;;  %v1364_v60 = vpop.f32.mrf.mxu0  ;;  %v1011_v38 = vld [vmem:[#allocation2 + $0xd7] sm:$0xff]  ;;  %v679_v22 = vadd.f32 %v678_v42, %v3790_v1 }
 0x1c7   :  { %982 = vst [vmem:[#allocation2 + $0xe0] sm:$0xff] %v952_v49  ;;  %v859_v48 = vadd.f32 %v824_v44, %v676_v55  ;;  %v1028_v59 = vpack.c.bf16 %v1011_v38, %v1010_v33  ;;  %v3862_v61 = vadd.f32 %v1364_v60, %v1232_v10  ;;  %v3872_v44 = vpop.permute.xlu1 %243 }
 0x1c8   :  { %1527 = vmatmul.bf16.gmra.mxu1 %v1113_v32 }
 0x1c9   :  { %v893_v29 = vadd.f32 %v3632_v37, %v859_v48  ;;  %1403 = vmatmul.bf16.gmra.mxu0 %v1028_v59 }
 0x1cb   :  { %v923_v43 = vmul.f32 %v893_v29, %v3865_v9 }
 0x1cc   :  { %v1234_v12 = vpop.f32.mrf.mxu3 }
 0x1cd   :  { %v953_v13 = vmax.f32 %v923_v43, 0.0  ;;  %v680_v10 = vpop.f32.mrf.mxu1  ;;  %v1092_v43 = vld [vmem:[#allocation2 + $0x91] sm:$0xff] }
 0x1ce   :  { %v827_v25 = vpop.f32.mrf.mxu2  ;;  %v1366_v39 = vpop.f32.mrf.mxu0  ;;  %v681_v36 = vadd.f32 %v680_v10, %v3798_v15  ;;  %v1012_v59 = vld [vmem:[#allocation2 + $0xdf] sm:$0xff] }
 0x1cf   :  { %983 = vst [vmem:[#allocation2 + $0xe8] sm:$0xff] %v953_v13  ;;  %v860_v34 = vadd.f32 %v827_v25, %v679_v22  ;;  %v3869_v19 = vadd.f32 %v1366_v39, %v1234_v12  ;;  %v1074_v30 = vpack.c.bf16 %v953_v13, %v952_v49  ;;  %v3124_v15 = vld [vmem:[%s4154_s4] ss:$0 sm:$0xff]  ;;  %v1114_v22 = vpack.c.bf16 %v1093_v51, %v1092_v43  ;;  %v3887_v25 = vpop.permute.xlu2 %248  ;;  %v1095_v43 = vld [vmem:[#allocation2 + $0xa9] sm:$0xff] }
 0x1d1   :  { %v894_v55 = vadd.f32 %v3632_v37, %v860_v34  ;;  %1276 = vmatmul.bf16.gmra.mxu3 %v1074_v30  ;;  %v3879_v37 = vld [vmem:[%s4154_s4 + $0x1] ss:$0 sm:$0xff] }
 0x1d3   :  { %v924_v60 = vmul.f32 %v894_v55, %v3872_v44 }
 0x1d4   :  { %v1237_v33 = vpop.f32.mrf.mxu3 }
 0x1d5   :  { %v954_v38 = vmax.f32 %v924_v60, 0.0  ;;  %v1493_v4 = vpop.f32.mrf.mxu1 }
 0x1d6   :  { %v829_v1 = vpop.f32.mrf.mxu2  ;;  %v1369_v48 = vpop.f32.mrf.mxu0  ;;  %v1013_v42 = vld [vmem:[#allocation2 + $0xe7] sm:$0xff]  ;;  %v1568_v13 = vadd.f32 %v1493_v4, %v3806_v62 }
 0x1d7   :  { %984 = vst [vmem:[#allocation2 + $0xf0] sm:$0xff] %v954_v38  ;;  %v861_v29 = vadd.f32 %v829_v1, %v681_v36  ;;  %v1029_v49 = vpack.c.bf16 %v1013_v42, %v1012_v59  ;;  %v3881_v32 = vadd.f32 %v1369_v48, %v1237_v33 }
 0x1d8   :  { %v1603_v34 = vadd.f32 %v3879_v37, %v1568_v13  ;;  %1532 = vmatmul.bf16.gmra.mxu1 %v1114_v22 }
 0x1d9   :  { %v895_v12 = vadd.f32 %v3124_v15, %v861_v29  ;;  %1408 = vmatmul.bf16.gmra.mxu0 %v1029_v49 }
 0x1da   :  { %v1633_v55 = vmul.f32 %v1603_v34, %v3634_v45 }
 0x1db   :  { %v925_v39 = vmul.f32 %v895_v12, %v3887_v25 }
 0x1dc   :  { %v1239_v30 = vpop.f32.mrf.mxu3  ;;  %v1663_v33 = vmax.f32 %v1633_v55, 0.0 }
 0x1dd   :  { %v955_v10 = vmax.f32 %v925_v39, 0.0  ;;  %v1495_v62 = vpop.f32.mrf.mxu1 }
 0x1de   :  { %v1371_v60 = vpop.f32.mrf.mxu0  ;;  %1693 = vst [vmem:[#allocation2 + $0x10] sm:$0xff] %v1663_v33  ;;  %v1569_v48 = vadd.f32 %v1495_v62, %v3813_v27  ;;  %v1014_v49 = vld [vmem:[#allocation2 + $0xef] sm:$0xff] }
 0x1df   :  { %985 = vst [vmem:[#allocation2 + $0xf8] sm:$0xff] %v955_v10  ;;  %v3892_v36 = vadd.f32 %v1371_v60, %v1239_v30  ;;  %v1075_v1 = vpack.c.bf16 %v955_v10, %v954_v38  ;;  %v1094_v38 = vld [vmem:[#allocation2 + $0xa1] sm:$0xff] }
 0x1e0   :  { %v1604_v59 = vadd.f32 %v3879_v37, %v1569_v48  ;;  %v1115_v27 = vpack.c.bf16 %v1095_v43, %v1094_v38  ;;  %v1097_v43 = vld [vmem:[#allocation2 + $0xb9] sm:$0xff]  ;;  %v1096_v38 = vld [vmem:[#allocation2 + $0xb1] sm:$0xff] }
 0x1e1   :  { %1281 = vmatmul.bf16.gmra.mxu3 %v1075_v1 }
 0x1e2   :  { %v1634_v51 = vmul.f32 %v1604_v59, %v3651_v5 }
 0x1e4   :  { %v1242_v42 = vpop.f32.mrf.mxu3  ;;  %v1664_v15 = vmax.f32 %v1634_v51, 0.0 }
 0x1e5   :  { %v1498_v22 = vpop.f32.mrf.mxu1  ;;  %v1723_v59 = vld [vmem:[#allocation2 + $0xf] sm:$0xff] }
 0x1e6   :  { %v1374_v29 = vpop.f32.mrf.mxu0  ;;  %v1015_v4 = vld [vmem:[#allocation2 + $0xf7] sm:$0xff]  ;;  %1694 = vst [vmem:[#allocation2 + $0x18] sm:$0xff] %v1664_v15  ;;  %v1570_v39 = vadd.f32 %v1498_v22, %v3820_v58  ;;  %v1798_v34 = vpack.c.bf16 %v1664_v15, %v1663_v33 }
 0x1e7   :  { %v1030_v12 = vpack.c.bf16 %v1015_v4, %v1014_v49  ;;  %v3897_v13 = vadd.f32 %v1374_v29, %v1242_v42 }
 0x1e8   :  { %v1605_v30 = vadd.f32 %v3879_v37, %v1570_v39  ;;  %1537 = vmatmul.bf16.gmra.mxu1 %v1115_v27  ;;  %1948 = vmatmul.bf16.vlgmr.msra.gmra.mxu2 %v1798_v34 }
 0x1e9   :  { %1413 = vmatmul.bf16.gmra.mxu0 %v1030_v12 }
 0x1ea   :  { %v1635_v55 = vmul.f32 %v1605_v30, %v3654_v14 }
 0x1ec   :  { %v1244_v10 = vpop.f32.mrf.mxu3  ;;  %v1665_v1 = vmax.f32 %v1635_v55, 0.0 }
 0x1ed   :  { %v1500_v48 = vpop.f32.mrf.mxu1  ;;  %v1724_v42 = vld [vmem:[#allocation2 + $0x17] sm:$0xff] }
 0x1ee   :  { %v1376_v60 = vpop.f32.mrf.mxu0  ;;  %1695 = vst [vmem:[#allocation2 + $0x20] sm:$0xff] %v1665_v1  ;;  %v1571_v58 = vadd.f32 %v1500_v48, %v3827_v17  ;;  %v1753_v51 = vpack.c.bf16 %v1724_v42, %v1723_v59  ;;  %v1813_v39 = vld [vmem:[#allocation2 + $0x11] sm:$0xff]  ;;  %v1116_v17 = vpack.c.bf16 %v1097_v43, %v1096_v38 }
 0x1ef   :  { %v3902_v62 = vadd.f32 %v1376_v60, %v1244_v10 }
 0x1f0   :  { %v1606_v33 = vadd.f32 %v3879_v37, %v1571_v58 }
 0x1f1   :  { %2080 = vmatmul.bf16.vlgmr.msra.gmra.mxu3 %v1753_v51 }
 0x1f2   :  { %v1636_v49 = vmul.f32 %v1606_v33, %v3671_v46 }
 0x1f4   :  { %v1247_v29 = vpop.f32.mrf.mxu3  ;;  %v1666_v15 = vmax.f32 %v1636_v49, 0.0 }
 0x1f5   :  { %v1503_v22 = vpop.f32.mrf.mxu1  ;;  %v1814_v27 = vld [vmem:[#allocation2 + $0x19] sm:$0xff] }
 0x1f6   :  { %v1379_v4 = vpop.f32.mrf.mxu0  ;;  %1696 = vst [vmem:[#allocation2 + $0x28] sm:$0xff] %v1666_v15  ;;  %v1572_v34 = vadd.f32 %v1503_v22, %v3834_v21  ;;  %v1843_v30 = vpack.c.bf16 %v1814_v27, %v1813_v39  ;;  %v1799_v10 = vpack.c.bf16 %v1666_v15, %v1665_v1  ;;  %v1725_v33 = vld [vmem:[#allocation2 + $0x1f] sm:$0xff]  ;;  %v1099_v22 = vld [vmem:[#allocation2 + $0xc9] sm:$0xff] }
 0x1f7   :  { %v3907_v12 = vadd.f32 %v1379_v4, %v1247_v29 }
 0x1f8   :  { %v1607_v55 = vadd.f32 %v3879_v37, %v1572_v34  ;;  %1542 = vmatmul.bf16.gmra.mxu1 %v1116_v17  ;;  %1953 = vmatmul.bf16.gmra.mxu2 %v1799_v10  ;;  %v1098_v34 = vld [vmem:[#allocation2 + $0xc1] sm:$0xff] }
 0x1f9   :  { %2229 = vmatmul.bf16.vlgmr.msra.gmra.mxu0 %v1843_v30 }
 0x1fa   :  { %v1637_v48 = vmul.f32 %v1607_v55, %v3674_v53 }
 0x1fc   :  { %v1249_v60 = vpop.f32.mrf.mxu3  ;;  %v1667_v42 = vmax.f32 %v1637_v48, 0.0 }
 0x1fd   :  { %v1505_v51 = vpop.f32.mrf.mxu1  ;;  %v1726_v29 = vld [vmem:[#allocation2 + $0x27] sm:$0xff] }
 0x1fe   :  { %v1381_v59 = vpop.f32.mrf.mxu0  ;;  %1697 = vst [vmem:[#allocation2 + $0x30] sm:$0xff] %v1667_v42  ;;  %v1573_v21 = vadd.f32 %v1505_v51, %v3841_v20  ;;  %v1754_v49 = vpack.c.bf16 %v1726_v29, %v1725_v33  ;;  %v1815_v17 = vld [vmem:[#allocation2 + $0x21] sm:$0xff]  ;;  %v1117_v20 = vpack.c.bf16 %v1099_v22, %v1098_v34 }
 0x1ff   :  { %v3912_v58 = vadd.f32 %v1381_v59, %v1249_v60 }
 0x200   :  { %v1608_v1 = vadd.f32 %v3879_v37, %v1573_v21 }
 0x201   :  { %2085 = vmatmul.bf16.gmra.mxu3 %v1754_v49 }
 0x202   :  { %v1638_v43 = vmul.f32 %v1608_v1, %v3691_v24 }
 0x204   :  { %v1252_v4 = vpop.f32.mrf.mxu3  ;;  %v1668_v38 = vmax.f32 %v1638_v43, 0.0 }
 0x205   :  { %v1508_v27 = vpop.f32.mrf.mxu1  ;;  %v1816_v30 = vld [vmem:[#allocation2 + $0x29] sm:$0xff] }
 0x206   :  { %v1384_v15 = vpop.f32.mrf.mxu0  ;;  %1698 = vst [vmem:[#allocation2 + $0x38] sm:$0xff] %v1668_v38  ;;  %v1574_v10 = vadd.f32 %v1508_v27, %v3848_v56  ;;  %v1844_v55 = vpack.c.bf16 %v1816_v30, %v1815_v17  ;;  %v1800_v60 = vpack.c.bf16 %v1668_v38, %v1667_v42  ;;  %v1727_v1 = vld [vmem:[#allocation2 + $0x2f] sm:$0xff]  ;;  %v1101_v27 = vld [vmem:[#allocation2 + $0xd9] sm:$0xff] }
 0x207   :  { %v3917_v39 = vadd.f32 %v1384_v15, %v1252_v4 }
 0x208   :  { %v1609_v48 = vadd.f32 %v3879_v37, %v1574_v10  ;;  %1547 = vmatmul.bf16.gmra.mxu1 %v1117_v20  ;;  %1958 = vmatmul.bf16.gmra.mxu2 %v1800_v60  ;;  %v1100_v10 = vld [vmem:[#allocation2 + $0xd1] sm:$0xff] }
 0x209   :  { %2234 = vmatmul.bf16.gmra.mxu0 %v1844_v55 }
 0x20a   :  { %v1639_v51 = vmul.f32 %v1609_v48, %v3695_v40 }
 0x20c   :  { %v1254_v59 = vpop.f32.mrf.mxu3  ;;  %v1669_v29 = vmax.f32 %v1639_v51, 0.0 }
 0x20d   :  { %v1510_v49 = vpop.f32.mrf.mxu1  ;;  %v1728_v4 = vld [vmem:[#allocation2 + $0x37] sm:$0xff] }
 0x20e   :  { %v1386_v33 = vpop.f32.mrf.mxu0  ;;  %1699 = vst [vmem:[#allocation2 + $0x40] sm:$0xff] %v1669_v29  ;;  %v1575_v56 = vadd.f32 %v1510_v49, %v3855_v16  ;;  %v1755_v43 = vpack.c.bf16 %v1728_v4, %v1727_v1  ;;  %v1817_v20 = vld [vmem:[#allocation2 + $0x31] sm:$0xff]  ;;  %v1118_v16 = vpack.c.bf16 %v1101_v27, %v1100_v10 }
 0x20f   :  { %v3922_v21 = vadd.f32 %v1386_v33, %v1254_v59 }
 0x210   :  { %v1610_v42 = vadd.f32 %v3879_v37, %v1575_v56 }
 0x211   :  { %2090 = vmatmul.bf16.gmra.mxu3 %v1755_v43 }
 0x212   :  { %v1640_v22 = vmul.f32 %v1610_v42, %v3711_v8 }
 0x214   :  { %v1257_v15 = vpop.f32.mrf.mxu3  ;;  %v1670_v34 = vmax.f32 %v1640_v22, 0.0 }
 0x215   :  { %v1513_v30 = vpop.f32.mrf.mxu1  ;;  %v1818_v55 = vld [vmem:[#allocation2 + $0x39] sm:$0xff] }
 0x216   :  { %v1389_v38 = vpop.f32.mrf.mxu0  ;;  %1700 = vst [vmem:[#allocation2 + $0x48] sm:$0xff] %v1670_v34  ;;  %v1576_v60 = vadd.f32 %v1513_v30, %v3862_v61  ;;  %v1845_v48 = vpack.c.bf16 %v1818_v55, %v1817_v20  ;;  %v1801_v59 = vpack.c.bf16 %v1670_v34, %v1669_v29  ;;  %v1729_v42 = vld [vmem:[#allocation2 + $0x3f] sm:$0xff]  ;;  %v1103_v30 = vld [vmem:[#allocation2 + $0xe9] sm:$0xff] }
 0x217   :  { %v3927_v17 = vadd.f32 %v1389_v38, %v1257_v15 }
 0x218   :  { %v1611_v51 = vadd.f32 %v3879_v37, %v1576_v60  ;;  %1552 = vmatmul.bf16.gmra.mxu1 %v1118_v16  ;;  %1963 = vmatmul.bf16.gmra.mxu2 %v1801_v59  ;;  %v1102_v60 = vld [vmem:[#allocation2 + $0xe1] sm:$0xff] }
 0x219   :  { %2239 = vmatmul.bf16.gmra.mxu0 %v1845_v48 }
 0x21a   :  { %v1641_v49 = vmul.f32 %v1611_v51, %v3716_v23 }
 0x21c   :  { %v1259_v33 = vpop.f32.mrf.mxu3  ;;  %v1671_v4 = vmax.f32 %v1641_v49, 0.0 }
 0x21d   :  { %v1515_v43 = vpop.f32.mrf.mxu1  ;;  %v1730_v15 = vld [vmem:[#allocation2 + $0x47] sm:$0xff] }
 0x21e   :  { %v1391_v1 = vpop.f32.mrf.mxu0  ;;  %1701 = vst [vmem:[#allocation2 + $0x50] sm:$0xff] %v1671_v4  ;;  %v1577_v61 = vadd.f32 %v1515_v43, %v3869_v19  ;;  %v1756_v22 = vpack.c.bf16 %v1730_v15, %v1729_v42  ;;  %v1819_v16 = vld [vmem:[#allocation2 + $0x41] sm:$0xff]  ;;  %v1119_v19 = vpack.c.bf16 %v1103_v30, %v1102_v60  ;;  %v1105_v60 = vld [vmem:[#allocation2 + $0xf9] sm:$0xff] }
 0x21f   :  { %v3932_v56 = vadd.f32 %v1391_v1, %v1259_v33 }
 0x220   :  { %v1612_v29 = vadd.f32 %v3879_v37, %v1577_v61 }
 0x221   :  { %2095 = vmatmul.bf16.gmra.mxu3 %v1756_v22 }
 0x222   :  { %v1642_v27 = vmul.f32 %v1612_v29, %v3733_v52 }
 0x224   :  { %v1262_v38 = vpop.f32.mrf.mxu3  ;;  %v1672_v10 = vmax.f32 %v1642_v27, 0.0 }
 0x225   :  { %v1518_v55 = vpop.f32.mrf.mxu1  ;;  %v1820_v48 = vld [vmem:[#allocation2 + $0x49] sm:$0xff] }
 0x226   :  { %v1394_v34 = vpop.f32.mrf.mxu0  ;;  %1702 = vst [vmem:[#allocation2 + $0x58] sm:$0xff] %v1672_v10  ;;  %v1578_v59 = vadd.f32 %v1518_v55, %v3881_v32  ;;  %v1846_v51 = vpack.c.bf16 %v1820_v48, %v1819_v16  ;;  %v1802_v33 = vpack.c.bf16 %v1672_v10, %v1671_v4  ;;  %v1731_v29 = vld [vmem:[#allocation2 + $0x4f] sm:$0xff] }
 0x227   :  { %v3937_v20 = vadd.f32 %v1394_v34, %v1262_v38  ;;  %v1104_v55 = vld [vmem:[#allocation2 + $0xf1] sm:$0xff] }
 0x228   :  { %v1613_v49 = vadd.f32 %v3879_v37, %v1578_v59  ;;  %1557 = vmatmul.bf16.gmra.mxu1 %v1119_v19  ;;  %1968 = vmatmul.bf16.gmra.mxu2 %v1802_v33 }
 0x229   :  { %2244 = vmatmul.bf16.gmra.mxu0 %v1846_v51 }
 0x22a   :  { %v1643_v43 = vmul.f32 %v1613_v49, %v3738_v63 }
 0x22c   :  { %v1264_v1 = vpop.f32.mrf.mxu3  ;;  %v1673_v15 = vmax.f32 %v1643_v43, 0.0 }
 0x22d   :  { %v1520_v22 = vpop.f32.mrf.mxu1  ;;  %v1732_v38 = vld [vmem:[#allocation2 + $0x57] sm:$0xff] }
 0x22e   :  { %v1396_v42 = vpop.f32.mrf.mxu0  ;;  %1703 = vst [vmem:[#allocation2 + $0x60] sm:$0xff] %v1673_v15  ;;  %v1579_v32 = vadd.f32 %v1520_v22, %v3892_v36  ;;  %v1757_v27 = vpack.c.bf16 %v1732_v38, %v1731_v29  ;;  %v1821_v19 = vld [vmem:[#allocation2 + $0x51] sm:$0xff]  ;;  %v1120_v36 = vpack.c.bf16 %v1105_v60, %v1104_v55 }
 0x22f   :  { %v3942_v61 = vadd.f32 %v1396_v42, %v1264_v1 }
 0x230   :  { %v1614_v4 = vadd.f32 %v3879_v37, %v1579_v32 }
 0x231   :  { %2100 = vmatmul.bf16.gmra.mxu3 %v1757_v27 }
 0x232   :  { %v1644_v30 = vmul.f32 %v1614_v4, %v3755_v28 }
 0x234   :  { %v1267_v34 = vpop.f32.mrf.mxu3  ;;  %v1674_v16 = vmax.f32 %v1644_v30, 0.0 }
 0x235   :  { %v1523_v59 = vpop.f32.mrf.mxu1  ;;  %v1822_v51 = vld [vmem:[#allocation2 + $0x59] sm:$0xff] }
 0x236   :  { %v1399_v10 = vpop.f32.mrf.mxu0  ;;  %1704 = vst [vmem:[#allocation2 + $0x68] sm:$0xff] %v1674_v16  ;;  %v1580_v33 = vadd.f32 %v1523_v59, %v3897_v13  ;;  %v1847_v49 = vpack.c.bf16 %v1822_v51, %v1821_v19  ;;  %v1803_v1 = vpack.c.bf16 %v1674_v16, %v1673_v15  ;;  %v1733_v4 = vld [vmem:[#allocation2 + $0x5f] sm:$0xff] }
 0x237   :  { %v3947_v48 = vadd.f32 %v1399_v10, %v1267_v34 }
 0x238   :  { %v1615_v43 = vadd.f32 %v3879_v37, %v1580_v33  ;;  %1562 = vmatmul.bf16.gmra.mxu1 %v1120_v36  ;;  %1973 = vmatmul.bf16.gmra.mxu2 %v1803_v1 }
 0x239   :  { %2249 = vmatmul.bf16.gmra.mxu0 %v1847_v49 }
 0x23a   :  { %v1645_v22 = vmul.f32 %v1615_v43, %v3762_v47 }
 0x23c   :  { %v1269_v42 = vpop.f32.mrf.mxu3  ;;  %v1675_v38 = vmax.f32 %v1645_v22, 0.0 }
 0x23d   :  { %v1525_v27 = vpop.f32.mrf.mxu1  ;;  %v1734_v34 = vld [vmem:[#allocation2 + $0x67] sm:$0xff] }
 0x23e   :  { %v1401_v29 = vpop.f32.mrf.mxu0  ;;  %1705 = vst [vmem:[#allocation2 + $0x70] sm:$0xff] %v1675_v38  ;;  %v1581_v13 = vadd.f32 %v1525_v27, %v3902_v62  ;;  %v1758_v30 = vpack.c.bf16 %v1734_v34, %v1733_v4  ;;  %v1823_v51 = vld [vmem:[#allocation2 + $0x61] sm:$0xff] }
 0x23f   :  { %v3952_v32 = vadd.f32 %v1401_v29, %v1269_v42 }
 0x240   :  { %v1616_v15 = vadd.f32 %v3879_v37, %v1581_v13 }
 0x241   :  { %2105 = vmatmul.bf16.gmra.mxu3 %v1758_v30 }
 0x242   :  { %v1646_v55 = vmul.f32 %v1616_v15, %v3769_v2 }
 0x244   :  { %v1272_v10 = vpop.f32.mrf.mxu3  ;;  %v1676_v16 = vmax.f32 %v1646_v55, 0.0 }
 0x245   :  { %v1528_v19 = vpop.f32.mrf.mxu1  ;;  %v1824_v33 = vld [vmem:[#allocation2 + $0x69] sm:$0xff] }
 0x246   :  { %v1404_v60 = vpop.f32.mrf.mxu0  ;;  %1706 = vst [vmem:[#allocation2 + $0x78] sm:$0xff] %v1676_v16  ;;  %v1582_v36 = vadd.f32 %v1528_v19, %v3907_v12  ;;  %v1848_v49 = vpack.c.bf16 %v1824_v33, %v1823_v51  ;;  %v1804_v1 = vpack.c.bf16 %v1676_v16, %v1675_v38  ;;  %v1735_v34 = vld [vmem:[#allocation2 + $0x6f] sm:$0xff] }
 0x247   :  { %v3957_v59 = vadd.f32 %v1404_v60, %v1272_v10 }
 0x248   :  { %v1617_v62 = vadd.f32 %v3879_v37, %v1582_v36  ;;  %1978 = vmatmul.bf16.gmra.mxu2 %v1804_v1 }
 0x249   :  { %2254 = vmatmul.bf16.gmra.mxu0 %v1848_v49 }
 0x24a   :  { %v1647_v42 = vmul.f32 %v1617_v62, %v3776_v18 }
 0x24c   :  { %v1274_v43 = vpop.f32.mrf.mxu3  ;;  %v1677_v29 = vmax.f32 %v1647_v42, 0.0 }
 0x24d   :  { %v1530_v4 = vpop.f32.mrf.mxu1  ;;  %v1736_v13 = vld [vmem:[#allocation2 + $0x77] sm:$0xff] }
 0x24e   :  { %v1406_v22 = vpop.f32.mrf.mxu0  ;;  %1707 = vst [vmem:[#allocation2 + $0x80] sm:$0xff] %v1677_v29  ;;  %v1583_v30 = vadd.f32 %v1530_v4, %v3912_v58  ;;  %v1759_v12 = vpack.c.bf16 %v1736_v13, %v1735_v34  ;;  %v1825_v51 = vld [vmem:[#allocation2 + $0x71] sm:$0xff] }
 0x24f   :  { %v3962_v27 = vadd.f32 %v1406_v22, %v1274_v43 }
 0x250   :  { %v1618_v38 = vadd.f32 %v3879_v37, %v1583_v30 }
 0x251   :  { %2110 = vmatmul.bf16.gmra.mxu3 %v1759_v12 }
 0x252   :  { %v1648_v10 = vmul.f32 %v1618_v38, %v3783_v54 }
 0x254   :  { %v1277_v15 = vpop.f32.mrf.mxu3  ;;  %v1678_v60 = vmax.f32 %v1648_v10, 0.0 }
 0x255   :  { %v1533_v19 = vpop.f32.mrf.mxu1  ;;  %v1826_v33 = vld [vmem:[#allocation2 + $0x79] sm:$0xff] }
 0x256   :  { %v1409_v55 = vpop.f32.mrf.mxu0  ;;  %1708 = vst [vmem:[#allocation2 + $0x88] sm:$0xff] %v1678_v60  ;;  %v1584_v36 = vadd.f32 %v1533_v19, %v3917_v39  ;;  %v1849_v49 = vpack.c.bf16 %v1826_v33, %v1825_v51  ;;  %v1805_v1 = vpack.c.bf16 %v1678_v60, %v1677_v29  ;;  %v1737_v13 = vld [vmem:[#allocation2 + $0x7f] sm:$0xff] }
 0x257   :  { %v3967_v16 = vadd.f32 %v1409_v55, %v1277_v15 }
 0x258   :  { %v1619_v58 = vadd.f32 %v3879_v37, %v1584_v36  ;;  %1983 = vmatmul.bf16.gmra.mxu2 %v1805_v1 }
 0x259   :  { %2259 = vmatmul.bf16.gmra.mxu0 %v1849_v49 }
 0x25a   :  { %v1649_v43 = vmul.f32 %v1619_v58, %v3788_v0 }
 0x25c   :  { %v1279_v62 = vpop.f32.mrf.mxu3  ;;  %v1679_v22 = vmax.f32 %v1649_v43, 0.0 }
 0x25d   :  { %v1535_v34 = vpop.f32.mrf.mxu1  ;;  %v1738_v30 = vld [vmem:[#allocation2 + $0x87] sm:$0xff] }
 0x25e   :  { %v1411_v42 = vpop.f32.mrf.mxu0  ;;  %1709 = vst [vmem:[#allocation2 + $0x90] sm:$0xff] %v1679_v22  ;;  %v1585_v12 = vadd.f32 %v1535_v34, %v3922_v21  ;;  %v1760_v39 = vpack.c.bf16 %v1738_v30, %v1737_v13  ;;  %v1827_v51 = vld [vmem:[#allocation2 + $0x81] sm:$0xff] }
 0x25f   :  { %v3972_v4 = vadd.f32 %v1411_v42, %v1279_v62 }
 0x260   :  { %v1620_v29 = vadd.f32 %v3879_v37, %v1585_v12 }
 0x261   :  { %2115 = vmatmul.bf16.gmra.mxu3 %v1760_v39 }
 0x262   :  { %v1650_v15 = vmul.f32 %v1620_v29, %v3795_v26 }
 0x264   :  { %v1282_v38 = vpop.f32.mrf.mxu3  ;;  %v1680_v55 = vmax.f32 %v1650_v15, 0.0 }
 0x265   :  { %v1538_v19 = vpop.f32.mrf.mxu1  ;;  %v1828_v33 = vld [vmem:[#allocation2 + $0x89] sm:$0xff] }
 0x266   :  { %v1414_v10 = vpop.f32.mrf.mxu0  ;;  %1710 = vst [vmem:[#allocation2 + $0x98] sm:$0xff] %v1680_v55  ;;  %v1586_v36 = vadd.f32 %v1538_v19, %v3927_v17  ;;  %v1850_v49 = vpack.c.bf16 %v1828_v33, %v1827_v51  ;;  %v1806_v1 = vpack.c.bf16 %v1680_v55, %v1679_v22  ;;  %v1739_v12 = vld [vmem:[#allocation2 + $0x8f] sm:$0xff]  ;;  %v3990_v51 = vld [vmem:[%s4154_s4 + $0x2] ss:$0 sm:$0xff] }
 0x267   :  { %v3977_v60 = vadd.f32 %v1414_v10, %v1282_v38 }
 0x268   :  { %v1621_v21 = vadd.f32 %v3879_v37, %v1586_v36  ;;  %1988 = vmatmul.bf16.gmra.mxu2 %v1806_v1 }
 0x269   :  { %2264 = vmatmul.bf16.gmra.mxu0 %v1850_v49 }
 0x26a   :  { %v1651_v58 = vmul.f32 %v1621_v21, %v3802_v41 }
 0x26b   :  { %v1949_v42 = vpop.f32.mrf.mxu2 }
 0x26c   :  { %v1284_v62 = vpop.f32.mrf.mxu3  ;;  %v1681_v34 = vmax.f32 %v1651_v58, 0.0 }
 0x26d   :  { %v1540_v30 = vpop.f32.mrf.mxu1  ;;  %v1740_v39 = vld [vmem:[#allocation2 + $0x97] sm:$0xff] }
 0x26e   :  { %v1416_v43 = vpop.f32.mrf.mxu0  ;;  %1711 = vst [vmem:[#allocation2 + $0xa0] sm:$0xff] %v1681_v34  ;;  %v1587_v17 = vadd.f32 %v1540_v30, %v3932_v56  ;;  %v1761_v29 = vpack.c.bf16 %v1740_v39, %v1739_v12  ;;  %v1829_v49 = vld [vmem:[#allocation2 + $0x91] sm:$0xff]  ;;  %v2640_v56 = vlaneseq }
 0x26f   :  { %v3982_v13 = vadd.f32 %v1416_v43, %v1284_v62 }
 0x270   :  { %v1622_v22 = vadd.f32 %v3879_v37, %v1587_v17  ;;  %v3995_v12 = vand.u32 127, %v2640_v56 }
 0x271   :  { %2120 = vmatmul.bf16.gmra.mxu3 %v1761_v29  ;;  %v2433_v29 = vpop.permute.xlu0 %2432 }
 0x272   :  { %v1652_v38 = vmul.f32 %v1622_v22, %v3809_v57  ;;  %vm2642_vm0 = vcmp.lt.s32.totalorder %v3995_v12, 4 }
 0x273   :  { %v1951_v10 = vpop.f32.mrf.mxu2 }
 0x274   :  { %v2081_v15 = vpop.f32.mrf.mxu3  ;;  %v1682_v55 = vmax.f32 %v1652_v38, 0.0 }
 0x275   :  { %v2082_v19 = vadd.f32 %v2081_v15, %v1949_v42  ;;  %v1543_v33 = vpop.f32.mrf.mxu1  ;;  %v1830_v1 = vld [vmem:[#allocation2 + $0x99] sm:$0xff] }
 0x276   :  { %v2230_v36 = vpop.f32.mrf.mxu0  ;;  %1712 = vst [vmem:[#allocation2 + $0xa8] sm:$0xff] %v1682_v55  ;;  %v1588_v21 = vadd.f32 %v1543_v33, %v3937_v20  ;;  %v1851_v58 = vpack.c.bf16 %v1830_v1, %v1829_v49  ;;  %v1807_v43 = vpack.c.bf16 %v1682_v55, %v1681_v34 }
 0x277   :  { %v2305_v62 = vadd.f32 %v2230_v36, %v2082_v19  ;;  %v1741_v19 = vld [vmem:[#allocation2 + $0x9f] sm:$0xff] }
 0x278   :  { %v1623_v30 = vadd.f32 %v3879_v37, %v1588_v21  ;;  %1993 = vmatmul.bf16.gmra.mxu2 %v1807_v43 }
 0x279   :  { %2269 = vmatmul.bf16.gmra.mxu0 %v1851_v58  ;;  %v2340_v42 = vadd.f32 %v3990_v51, %v2305_v62 }
 0x27a   :  { %v1653_v39 = vmul.f32 %v1623_v30, %v3816_v35  ;;  %v2438_v30 = vpop.permute.xlu1 %2437 }
 0x27b   :  { %v2370_v17 = vmul.f32 %v2340_v42, %v3634_v45  ;;  %v1954_v33 = vpop.f32.mrf.mxu2 }
 0x27c   :  { %v2083_v22 = vpop.f32.mrf.mxu3  ;;  %v1683_v38 = vmax.f32 %v1653_v39, 0.0 }
 0x27d   :  { %v2580_v15 = vmul.f32 %v2433_v29, %v2370_v17  ;;  %v2084_v20 = vadd.f32 %v2083_v22, %v1951_v10  ;;  %v1545_v34 = vpop.f32.mrf.mxu1  ;;  %v1742_v36 = vld [vmem:[#allocation2 + $0xa7] sm:$0xff] }
 0x27e   :  { %v2232_v55 = vpop.f32.mrf.mxu0  ;;  %1713 = vst [vmem:[#allocation2 + $0xb0] sm:$0xff] %v1683_v38  ;;  %v1589_v1 = vadd.f32 %v1545_v34, %v3942_v61  ;;  %v1762_v21 = vpack.c.bf16 %v1742_v36, %v1741_v19  ;;  %v1831_v34 = vld [vmem:[#allocation2 + $0xa1] sm:$0xff] }
 0x27f   :  { %v2610_v49 = vmax.f32 %v2580_v15, 0.0  ;;  %v2306_v56 = vadd.f32 %v2232_v55, %v2084_v20 }
 0x280   :  { %v1624_v58 = vadd.f32 %v3879_v37, %v1589_v1 }
 0x281   :  { %v2645_v45 = vsel %vm2642_vm0, %v2370_v17, %v2610_v49  ;;  %v2341_v10 = vadd.f32 %v3990_v51, %v2306_v56  ;;  %2125 = vmatmul.bf16.gmra.mxu3 %v1762_v21 }
 0x282   :  { %2675 = vst [vmem:[#allocation6] sm:$0xff] %v2645_v45  ;;  %v1654_v62 = vmul.f32 %v1624_v58, %v3823_v7  ;;  %v2443_v58 = vpop.permute.xlu2 %2442 }
 0x283   :  { %v2371_v43 = vmul.f32 %v2341_v10, %v3651_v5  ;;  %v1956_v22 = vpop.f32.mrf.mxu2 }
 0x284   :  { %v2086_v42 = vpop.f32.mrf.mxu3  ;;  %v1684_v39 = vmax.f32 %v1654_v62, 0.0 }
 0x285   :  { %v2581_v29 = vmul.f32 %v2438_v30, %v2371_v43  ;;  %v2087_v61 = vadd.f32 %v2086_v42, %v1954_v33  ;;  %v1548_v15 = vpop.f32.mrf.mxu1  ;;  %v1832_v17 = vld [vmem:[#allocation2 + $0xa9] sm:$0xff] }
 0x286   :  { %v2235_v20 = vpop.f32.mrf.mxu0  ;;  %1714 = vst [vmem:[#allocation2 + $0xb8] sm:$0xff] %v1684_v39  ;;  %v1590_v19 = vadd.f32 %v1548_v15, %v3947_v48  ;;  %v1852_v36 = vpack.c.bf16 %v1832_v17, %v1831_v34  ;;  %v1808_v1 = vpack.c.bf16 %v1684_v39, %v1683_v38 }
 0x287   :  { %v2611_v55 = vmax.f32 %v2581_v29, 0.0  ;;  %v2307_v49 = vadd.f32 %v2235_v20, %v2087_v61 }
 0x288   :  { %v1625_v56 = vadd.f32 %v3879_v37, %v1590_v19  ;;  %1998 = vmatmul.bf16.gmra.mxu2 %v1808_v1 }
 0x289   :  { %v2646_v5 = vsel %vm2642_vm0, %v2371_v43, %v2611_v55  ;;  %2274 = vmatmul.bf16.gmra.mxu0 %v1852_v36  ;;  %v2342_v33 = vadd.f32 %v3990_v51, %v2307_v49  ;;  %v1743_v43 = vld [vmem:[#allocation2 + $0xaf] sm:$0xff]  ;;  %v2448_v36 = vpop.permute.xlu0 %2447 }
 0x28a   :  { %2676 = vst [vmem:[#allocation6 + $0x8] sm:$0xff] %v2646_v5  ;;  %v1655_v21 = vmul.f32 %v1625_v56, %v3830_v31 }
 0x28b   :  { %v2372_v45 = vmul.f32 %v2342_v33, %v3654_v14  ;;  %v1959_v38 = vpop.f32.mrf.mxu2 }
 0x28c   :  { %v2088_v10 = vpop.f32.mrf.mxu3  ;;  %v1685_v48 = vmax.f32 %v1655_v21, 0.0 }
 0x28d   :  { %v2582_v62 = vmul.f32 %v2443_v58, %v2372_v45  ;;  %v2089_v30 = vadd.f32 %v2088_v10, %v1956_v22  ;;  %v1550_v42 = vpop.f32.mrf.mxu1  ;;  %v1744_v29 = vld [vmem:[#allocation2 + $0xb7] sm:$0xff] }
 0x28e   :  { %v2237_v39 = vpop.f32.mrf.mxu0  ;;  %1715 = vst [vmem:[#allocation2 + $0xc0] sm:$0xff] %v1685_v48  ;;  %v1591_v15 = vadd.f32 %v1550_v42, %v3952_v32  ;;  %v1763_v34 = vpack.c.bf16 %v1744_v29, %v1743_v43  ;;  %v1833_v58 = vld [vmem:[#allocation2 + $0xb1] sm:$0xff] }
 0x28f   :  { %v2612_v61 = vmax.f32 %v2582_v62, 0.0  ;;  %v2308_v20 = vadd.f32 %v2237_v39, %v2089_v30 }
 0x290   :  { %v1626_v14 = vadd.f32 %v3879_v37, %v1591_v15  ;;  %v2453_v15 = vpop.permute.xlu1 %2452 }
 0x291   :  { %v2647_v17 = vsel %vm2642_vm0, %v2372_v45, %v2612_v61  ;;  %v2343_v55 = vadd.f32 %v3990_v51, %v2308_v20  ;;  %2130 = vmatmul.bf16.gmra.mxu3 %v1763_v34 }
 0x292   :  { %2677 = vst [vmem:[#allocation6 + $0x10] sm:$0xff] %v2647_v17  ;;  %v1656_v22 = vmul.f32 %v1626_v14, %v3837_v11 }
 0x293   :  { %v2373_v19 = vmul.f32 %v2343_v55, %v3671_v46  ;;  %v1961_v56 = vpop.f32.mrf.mxu2 }
 0x294   :  { %v2091_v49 = vpop.f32.mrf.mxu3  ;;  %v1686_v1 = vmax.f32 %v1656_v22, 0.0 }
 0x295   :  { %v2583_v5 = vmul.f32 %v2448_v36, %v2373_v19  ;;  %v2092_v32 = vadd.f32 %v2091_v49, %v1959_v38  ;;  %v1553_v33 = vpop.f32.mrf.mxu1  ;;  %v1834_v45 = vld [vmem:[#allocation2 + $0xb9] sm:$0xff] }
 0x296   :  { %v2240_v21 = vpop.f32.mrf.mxu0  ;;  %1716 = vst [vmem:[#allocation2 + $0xc8] sm:$0xff] %v1686_v1  ;;  %v1592_v62 = vadd.f32 %v1553_v33, %v3957_v59  ;;  %v1853_v30 = vpack.c.bf16 %v1834_v45, %v1833_v58  ;;  %v1809_v39 = vpack.c.bf16 %v1686_v1, %v1685_v48  ;;  %v1745_v22 = vld [vmem:[#allocation2 + $0xbf] sm:$0xff]  ;;  %v2458_v58 = vpop.permute.xlu2 %2457 }
 0x297   :  { %v2613_v10 = vmax.f32 %v2583_v5, 0.0  ;;  %v2309_v42 = vadd.f32 %v2240_v21, %v2092_v32 }
 0x298   :  { %v1627_v43 = vadd.f32 %v3879_v37, %v1592_v62  ;;  %2003 = vmatmul.bf16.gmra.mxu2 %v1809_v39 }
 0x299   :  { %v2648_v46 = vsel %vm2642_vm0, %v2373_v19, %v2613_v10  ;;  %2279 = vmatmul.bf16.gmra.mxu0 %v1853_v30  ;;  %v2344_v38 = vadd.f32 %v3990_v51, %v2309_v42 }
 0x29a   :  { %2678 = vst [vmem:[#allocation6 + $0x18] sm:$0xff] %v2648_v46  ;;  %v1657_v29 = vmul.f32 %v1627_v43, %v3844_v50 }
 0x29b   :  { %v2374_v61 = vmul.f32 %v2344_v38, %v3674_v53  ;;  %v1964_v48 = vpop.f32.mrf.mxu2 }
 0x29c   :  { %v2093_v20 = vpop.f32.mrf.mxu3  ;;  %v1687_v59 = vmax.f32 %v1657_v29, 0.0 }
 0x29d   :  { %v2584_v34 = vmul.f32 %v2453_v15, %v2374_v61  ;;  %v2094_v17 = vadd.f32 %v2093_v20, %v1961_v56  ;;  %v1555_v14 = vpop.f32.mrf.mxu1  ;;  %v1746_v19 = vld [vmem:[#allocation2 + $0xc7] sm:$0xff] }
 0x29e   :  { %v2242_v55 = vpop.f32.mrf.mxu0  ;;  %1717 = vst [vmem:[#allocation2 + $0xd0] sm:$0xff] %v1687_v59  ;;  %v1593_v49 = vadd.f32 %v1555_v14, %v3962_v27  ;;  %v1764_v5 = vpack.c.bf16 %v1746_v19, %v1745_v22  ;;  %v1835_v46 = vld [vmem:[#allocation2 + $0xc1] sm:$0xff] }
 0x29f   :  { %v2614_v36 = vmax.f32 %v2584_v34, 0.0  ;;  %v2310_v1 = vadd.f32 %v2242_v55, %v2094_v17  ;;  %v2463_v55 = vpop.permute.xlu0 %2462 }
 0x2a0   :  { %v1628_v53 = vadd.f32 %v3879_v37, %v1593_v49 }
 0x2a1   :  { %v2649_v32 = vsel %vm2642_vm0, %v2374_v61, %v2614_v36  ;;  %v2345_v33 = vadd.f32 %v3990_v51, %v2310_v1  ;;  %2135 = vmatmul.bf16.gmra.mxu3 %v1764_v5 }
 0x2a2   :  { %2679 = vst [vmem:[#allocation6 + $0x20] sm:$0xff] %v2649_v32  ;;  %v1658_v56 = vmul.f32 %v1628_v53, %v3851_v6 }
 0x2a3   :  { %v2375_v21 = vmul.f32 %v2345_v33, %v3691_v24  ;;  %v1966_v30 = vpop.f32.mrf.mxu2 }
 0x2a4   :  { %v2096_v45 = vpop.f32.mrf.mxu3  ;;  %v1688_v10 = vmax.f32 %v1658_v56, 0.0 }
 0x2a5   :  { %v2585_v62 = vmul.f32 %v2458_v58, %v2375_v21  ;;  %v2097_v27 = vadd.f32 %v2096_v45, %v1964_v48  ;;  %v1558_v42 = vpop.f32.mrf.mxu1  ;;  %v1836_v43 = vld [vmem:[#allocation2 + $0xc9] sm:$0xff] }
 0x2a6   :  { %v2245_v39 = vpop.f32.mrf.mxu0  ;;  %1718 = vst [vmem:[#allocation2 + $0xd8] sm:$0xff] %v1688_v10  ;;  %v1594_v29 = vadd.f32 %v1558_v42, %v3967_v16  ;;  %v1854_v61 = vpack.c.bf16 %v1836_v43, %v1835_v46  ;;  %v1810_v20 = vpack.c.bf16 %v1688_v10, %v1687_v59  ;;  %v1747_v5 = vld [vmem:[#allocation2 + $0xcf] sm:$0xff] }
 0x2a7   :  { %v2615_v38 = vmax.f32 %v2585_v62, 0.0  ;;  %v2311_v15 = vadd.f32 %v2245_v39, %v2097_v27  ;;  %v2468_v27 = vpop.permute.xlu1 %2467 }
 0x2a8   :  { %v1629_v34 = vadd.f32 %v3879_v37, %v1594_v29  ;;  %2008 = vmatmul.bf16.gmra.mxu2 %v1810_v20 }
 0x2a9   :  { %v2650_v24 = vsel %vm2642_vm0, %v2375_v21, %v2615_v38  ;;  %2284 = vmatmul.bf16.gmra.mxu0 %v1854_v61  ;;  %v2346_v17 = vadd.f32 %v3990_v51, %v2311_v15 }
 0x2aa   :  { %2680 = vst [vmem:[#allocation6 + $0x28] sm:$0xff] %v2650_v24  ;;  %v1659_v48 = vmul.f32 %v1629_v34, %v3858_v3 }
 0x2ab   :  { %v2376_v14 = vmul.f32 %v2346_v17, %v3695_v40  ;;  %v1969_v59 = vpop.f32.mrf.mxu2 }
 0x2ac   :  { %v2098_v22 = vpop.f32.mrf.mxu3  ;;  %v1689_v16 = vmax.f32 %v1659_v48, 0.0 }
 0x2ad   :  { %v2586_v19 = vmul.f32 %v2463_v55, %v2376_v14  ;;  %v2099_v36 = vadd.f32 %v2098_v22, %v1966_v30  ;;  %v1560_v49 = vpop.f32.mrf.mxu1  ;;  %v1748_v32 = vld [vmem:[#allocation2 + $0xd7] sm:$0xff] }
 0x2ae   :  { %v2247_v1 = vpop.f32.mrf.mxu0  ;;  %1719 = vst [vmem:[#allocation2 + $0xe0] sm:$0xff] %v1689_v16  ;;  %v1595_v33 = vadd.f32 %v1560_v49, %v3972_v4  ;;  %v1765_v21 = vpack.c.bf16 %v1748_v32, %v1747_v5  ;;  %v1837_v29 = vld [vmem:[#allocation2 + $0xd1] sm:$0xff] }
 0x2af   :  { %v2616_v53 = vmax.f32 %v2586_v19, 0.0  ;;  %v2312_v56 = vadd.f32 %v2247_v1, %v2099_v36  ;;  %v2473_v19 = vpop.permute.xlu2 %2472 }
 0x2b0   :  { %v1630_v40 = vadd.f32 %v3879_v37, %v1595_v33 }
 0x2b1   :  { %v2651_v58 = vsel %vm2642_vm0, %v2376_v14, %v2616_v53  ;;  %v2347_v45 = vadd.f32 %v3990_v51, %v2312_v56  ;;  %2140 = vmatmul.bf16.gmra.mxu3 %v1765_v21 }
 0x2b2   :  { %2681 = vst [vmem:[#allocation6 + $0x30] sm:$0xff] %v2651_v58  ;;  %v1660_v10 = vmul.f32 %v1630_v40, %v3865_v9 }
 0x2b3   :  { %v2377_v62 = vmul.f32 %v2347_v45, %v3711_v8  ;;  %v1971_v46 = vpop.f32.mrf.mxu2 }
 0x2b4   :  { %v2101_v30 = vpop.f32.mrf.mxu3  ;;  %v1690_v42 = vmax.f32 %v1660_v10, 0.0 }
 0x2b5   :  { %v2587_v39 = vmul.f32 %v2468_v27, %v2377_v62  ;;  %v2102_v4 = vadd.f32 %v2101_v30, %v1969_v59  ;;  %v1563_v43 = vpop.f32.mrf.mxu1  ;;  %v1838_v61 = vld [vmem:[#allocation2 + $0xd9] sm:$0xff]  ;;  %v2478_v27 = vpop.permute.xlu0 %2477 }
 0x2b6   :  { %v2250_v38 = vpop.f32.mrf.mxu0  ;;  %1720 = vst [vmem:[#allocation2 + $0xe8] sm:$0xff] %v1690_v42  ;;  %v1596_v20 = vadd.f32 %v1563_v43, %v3977_v60  ;;  %v1855_v24 = vpack.c.bf16 %v1838_v61, %v1837_v29  ;;  %v1811_v17 = vpack.c.bf16 %v1690_v42, %v1689_v16  ;;  %v1749_v32 = vld [vmem:[#allocation2 + $0xdf] sm:$0xff] }
 0x2b7   :  { %v2617_v15 = vmax.f32 %v2587_v39, 0.0  ;;  %v2313_v34 = vadd.f32 %v2250_v38, %v2102_v4 }
 0x2b8   :  { %v1631_v48 = vadd.f32 %v3879_v37, %v1596_v20  ;;  %2013 = vmatmul.bf16.gmra.mxu2 %v1811_v17  ;;  %v2483_v17 = vpop.permute.xlu1 %2482 }
 0x2b9   :  { %v2652_v8 = vsel %vm2642_vm0, %v2377_v62, %v2617_v15  ;;  %2289 = vmatmul.bf16.gmra.mxu0 %v1855_v24  ;;  %v2348_v14 = vadd.f32 %v3990_v51, %v2313_v34 }
 0x2ba   :  { %2682 = vst [vmem:[#allocation6 + $0x38] sm:$0xff] %v2652_v8  ;;  %v1661_v55 = vmul.f32 %v1631_v48, %v3872_v44 }
 0x2bb   :  { %v2378_v22 = vmul.f32 %v2348_v14, %v3716_v23  ;;  %v1974_v16 = vpop.f32.mrf.mxu2  ;;  %v3125_v23 = vld [vmem:[%s4154_s4 + $0x1] ss:$0 sm:$0xff]  ;;  %s3183_s4 = smov [#allocation6]  }
 0x2bc   :  { %v2103_v36 = vpop.f32.mrf.mxu3  ;;  %v1691_v60 = vmax.f32 %v1661_v55, 0.0  ;;  %s2709_s10 = sshll.u32 %s3183_s4, 4  ;;  %s2710_s10 = int_to_ptr.vmem [resolvable:$true] %s2709_s10 }
 0x2bd   :  { %v2588_v59 = vmul.f32 %v2473_v19, %v2378_v22  ;;  %v2104_v49 = vadd.f32 %v2103_v36, %v1971_v46  ;;  %v1565_v1 = vpop.f32.mrf.mxu1  ;;  %v1750_v53 = vld [vmem:[#allocation2 + $0xe7] sm:$0xff] }
 0x2be   :  { %v2252_v5 = vpop.f32.mrf.mxu0  ;;  %1721 = vst [vmem:[#allocation2 + $0xf0] sm:$0xff] %v1691_v60  ;;  %v1597_v33 = vadd.f32 %v1565_v1, %v3982_v13  ;;  %v1766_v21 = vpack.c.bf16 %v1750_v53, %v1749_v32  ;;  %v1839_v43 = vld [vmem:[#allocation2 + $0xe1] sm:$0xff] }
 0x2bf   :  { %v2618_v37 = vmax.f32 %v2588_v59, 0.0  ;;  %v2314_v56 = vadd.f32 %v2252_v5, %v2104_v49  ;;  %v2488_v5 = vpop.permute.xlu2 %2487 }
 0x2c0   :  { %v1632_v40 = vadd.f32 %v3125_v23, %v1597_v33 }
 0x2c1   :  { %v2653_v58 = vsel %vm2642_vm0, %v2378_v22, %v2618_v37  ;;  %v2349_v45 = vadd.f32 %v3990_v51, %v2314_v56  ;;  %2145 = vmatmul.bf16.gmra.mxu3 %v1766_v21 }
 0x2c2   :  { %2683 = vst [vmem:[#allocation6 + $0x40] sm:$0xff] %v2653_v58  ;;  %v1662_v10 = vmul.f32 %v1632_v40, %v3887_v25 }
 0x2c3   :  { %v2379_v62 = vmul.f32 %v2349_v45, %v3733_v52  ;;  %v1976_v4 = vpop.f32.mrf.mxu2 }
 0x2c4   :  { %v2106_v13 = vpop.f32.mrf.mxu3  ;;  %v1692_v30 = vmax.f32 %v1662_v10, 0.0 }
 0x2c5   :  { %v2589_v42 = vmul.f32 %v2478_v27, %v2379_v62  ;;  %v2107_v39 = vadd.f32 %v2106_v13, %v1974_v16  ;;  %v1840_v38 = vld [vmem:[#allocation2 + $0xe9] sm:$0xff]  ;;  %v2493_v27 = vpop.permute.xlu0 %2492 }
 0x2c6   :  { %v2255_v46 = vpop.f32.mrf.mxu0  ;;  %1722 = vst [vmem:[#allocation2 + $0xf8] sm:$0xff] %v1692_v30  ;;  %v1856_v61 = vpack.c.bf16 %v1840_v38, %v1839_v43  ;;  %v1812_v20 = vpack.c.bf16 %v1692_v30, %v1691_v60  ;;  %v1751_v19 = vld [vmem:[#allocation2 + $0xef] sm:$0xff] }
 0x2c7   :  { %v2619_v29 = vmax.f32 %v2589_v42, 0.0  ;;  %v2315_v15 = vadd.f32 %v2255_v46, %v2107_v39 }
 0x2c8   :  { %2018 = vmatmul.bf16.gmra.mxu2 %v1812_v20 }
 0x2c9   :  { %v2654_v24 = vsel %vm2642_vm0, %v2379_v62, %v2619_v29  ;;  %2294 = vmatmul.bf16.gmra.mxu0 %v1856_v61  ;;  %v2350_v52 = vadd.f32 %v3990_v51, %v2315_v15  ;;  %v2498_v15 = vpop.permute.xlu1 %2497 }
 0x2ca   :  { %2684 = vst [vmem:[#allocation6 + $0x48] sm:$0xff] %v2654_v24 }
 0x2cb   :  { %v2380_v34 = vmul.f32 %v2350_v52, %v3738_v63  ;;  %v1979_v55 = vpop.f32.mrf.mxu2 }
 0x2cc   :  { %v2108_v8 = vpop.f32.mrf.mxu3 }
 0x2cd   :  { %v2590_v48 = vmul.f32 %v2483_v17, %v2380_v34  ;;  %v2109_v14 = vadd.f32 %v2108_v8, %v1976_v4  ;;  %v1752_v36 = vld [vmem:[#allocation2 + $0xf7] sm:$0xff] }
 0x2ce   :  { %v2257_v22 = vpop.f32.mrf.mxu0  ;;  %v1767_v49 = vpack.c.bf16 %v1752_v36, %v1751_v19  ;;  %v1841_v32 = vld [vmem:[#allocation2 + $0xf1] sm:$0xff]  ;;  %v1842_v53 = vld [vmem:[#allocation2 + $0xf9] sm:$0xff] }
 0x2cf   :  { %v2620_v59 = vmax.f32 %v2590_v48, 0.0  ;;  %v2316_v60 = vadd.f32 %v2257_v22, %v2109_v14  ;;  %v1857_v40 = vpack.c.bf16 %v1842_v53, %v1841_v32  ;;  %v2503_v22 = vpop.permute.xlu2 %2502  ;;  %v2508_v32 = vpop.permute.xlu0 %2507 }
 0x2d1   :  { %v2655_v16 = vsel %vm2642_vm0, %v2380_v34, %v2620_v59  ;;  %v2351_v1 = vadd.f32 %v3990_v51, %v2316_v60  ;;  %2150 = vmatmul.bf16.gmra.mxu3 %v1767_v49 }
 0x2d2   :  { %2685 = vst [vmem:[#allocation6 + $0x50] sm:$0xff] %v2655_v16 }
 0x2d3   :  { %v2381_v63 = vmul.f32 %v2351_v1, %v3755_v28  ;;  %v1981_v21 = vpop.f32.mrf.mxu2 }
 0x2d4   :  { %v2111_v37 = vpop.f32.mrf.mxu3 }
 0x2d5   :  { %v2591_v33 = vmul.f32 %v2488_v5, %v2381_v63  ;;  %v2112_v56 = vadd.f32 %v2111_v37, %v1979_v55 }
 0x2d6   :  { %v2260_v58 = vpop.f32.mrf.mxu0 }
 0x2d7   :  { %v2621_v23 = vmax.f32 %v2591_v33, 0.0  ;;  %v2317_v45 = vadd.f32 %v2260_v58, %v2112_v56 }
 0x2d9   :  { %v2656_v10 = vsel %vm2642_vm0, %v2381_v63, %v2621_v23  ;;  %2299 = vmatmul.bf16.gmra.mxu0 %v1857_v40  ;;  %v2352_v62 = vadd.f32 %v3990_v51, %v2317_v45 }
 0x2da   :  { %2686 = vst [vmem:[#allocation6 + $0x58] sm:$0xff] %v2656_v10  ;;  %v2513_v10 = vpop.permute.xlu1 %2512 }
 0x2db   :  { %v2382_v28 = vmul.f32 %v2352_v62, %v3762_v47  ;;  %v1984_v39 = vpop.f32.mrf.mxu2 }
 0x2dc   :  { %v2113_v13 = vpop.f32.mrf.mxu3 }
 0x2dd   :  { %v2592_v30 = vmul.f32 %v2493_v27, %v2382_v28  ;;  %v2114_v42 = vadd.f32 %v2113_v13, %v1981_v21 }
 0x2de   :  { %v2262_v4 = vpop.f32.mrf.mxu0 }
 0x2df   :  { %v2622_v46 = vmax.f32 %v2592_v30, 0.0  ;;  %v2318_v43 = vadd.f32 %v2262_v4, %v2114_v42 }
 0x2e1   :  { %v2657_v38 = vsel %vm2642_vm0, %v2382_v28, %v2622_v46  ;;  %v2353_v29 = vadd.f32 %v3990_v51, %v2318_v43  ;;  %v2518_v43 = vpop.permute.xlu2 %2517 }
 0x2e2   :  { %2687 = vst [vmem:[#allocation6 + $0x60] sm:$0xff] %v2657_v38 }
 0x2e3   :  { %v2383_v61 = vmul.f32 %v2353_v29, %v3769_v2  ;;  %v1986_v52 = vpop.f32.mrf.mxu2 }
 0x2e4   :  { %v2116_v20 = vpop.f32.mrf.mxu3 }
 0x2e5   :  { %v2593_v24 = vmul.f32 %v2498_v15, %v2383_v61  ;;  %v2117_v47 = vadd.f32 %v2116_v20, %v1984_v39 }
 0x2e6   :  { %v2265_v34 = vpop.f32.mrf.mxu0 }
 0x2e7   :  { %v2623_v17 = vmax.f32 %v2593_v24, 0.0  ;;  %v2319_v8 = vadd.f32 %v2265_v34, %v2117_v47 }
 0x2e9   :  { %v2658_v48 = vsel %vm2642_vm0, %v2383_v61, %v2623_v17  ;;  %v2354_v14 = vadd.f32 %v3990_v51, %v2319_v8  ;;  %v2523_v17 = vpop.permute.xlu0 %2522 }
 0x2ea   :  { %2688 = vst [vmem:[#allocation6 + $0x68] sm:$0xff] %v2658_v48 }
 0x2eb   :  { %v2384_v55 = vmul.f32 %v2354_v14, %v3776_v18  ;;  %v1989_v59 = vpop.f32.mrf.mxu2 }
 0x2ec   :  { %v2118_v19 = vpop.f32.mrf.mxu3 }
 0x2ed   :  { %v2594_v36 = vmul.f32 %v2503_v22, %v2384_v55  ;;  %v2119_v2 = vadd.f32 %v2118_v19, %v1986_v52 }
 0x2ee   :  { %v2267_v60 = vpop.f32.mrf.mxu0 }
 0x2ef   :  { %v2624_v49 = vmax.f32 %v2594_v36, 0.0  ;;  %v2320_v16 = vadd.f32 %v2267_v60, %v2119_v2  ;;  %v2528_v60 = vpop.permute.xlu1 %2527 }
 0x2f1   :  { %v2659_v1 = vsel %vm2642_vm0, %v2384_v55, %v2624_v49  ;;  %v2355_v63 = vadd.f32 %v3990_v51, %v2320_v16 }
 0x2f2   :  { %2689 = vst [vmem:[#allocation6 + $0x70] sm:$0xff] %v2659_v1 }
 0x2f3   :  { %v2385_v5 = vmul.f32 %v2355_v63, %v3783_v54  ;;  %v1991_v33 = vpop.f32.mrf.mxu2 }
 0x2f4   :  { %v2121_v53 = vpop.f32.mrf.mxu3 }
 0x2f5   :  { %v2595_v37 = vmul.f32 %v2508_v32, %v2385_v5  ;;  %v2122_v18 = vadd.f32 %v2121_v53, %v1989_v59 }
 0x2f6   :  { %v2270_v56 = vpop.f32.mrf.mxu0 }
 0x2f7   :  { %v2625_v21 = vmax.f32 %v2595_v37, 0.0  ;;  %v2321_v58 = vadd.f32 %v2270_v56, %v2122_v18 }
 0x2f9   :  { %v2660_v23 = vsel %vm2642_vm0, %v2385_v5, %v2625_v21  ;;  %v2356_v40 = vadd.f32 %v3990_v51, %v2321_v58 }
 0x2fa   :  { %2690 = vst [vmem:[#allocation6 + $0x78] sm:$0xff] %v2660_v23 }
 0x2fb   :  { %v2386_v45 = vmul.f32 %v2356_v40, %v3788_v0  ;;  %v1994_v27 = vpop.f32.mrf.mxu2 }
 0x2fc   :  { %v2123_v62 = vpop.f32.mrf.mxu3 }
 0x2fd   :  { %v2596_v28 = vmul.f32 %v2513_v10, %v2386_v45  ;;  %v2124_v54 = vadd.f32 %v2123_v62, %v1991_v33  ;;  %v2533_v33 = vpop.permute.xlu2 %2532 }
 0x2fe   :  { %v2272_v13 = vpop.f32.mrf.mxu0 }
 0x2ff   :  { %v2626_v30 = vmax.f32 %v2596_v28, 0.0  ;;  %v2322_v42 = vadd.f32 %v2272_v13, %v2124_v54  ;;  %v2538_v54 = vpop.permute.xlu0 %2537 }
 0x301   :  { %v2661_v39 = vsel %vm2642_vm0, %v2386_v45, %v2626_v30  ;;  %v2357_v4 = vadd.f32 %v3990_v51, %v2322_v42 }
 0x302   :  { %2691 = vst [vmem:[#allocation6 + $0x80] sm:$0xff] %v2661_v39 }
 0x303   :  { %v2387_v46 = vmul.f32 %v2357_v4, %v3795_v26  ;;  %v1996_v61 = vpop.f32.mrf.mxu2 }
 0x304   :  { %v2126_v38 = vpop.f32.mrf.mxu3 }
 0x305   :  { %v2597_v29 = vmul.f32 %v2518_v43, %v2387_v46  ;;  %v2127_v0 = vadd.f32 %v2126_v38, %v1994_v27 }
 0x306   :  { %v2275_v15 = vpop.f32.mrf.mxu0 }
 0x307   :  { %v2627_v20 = vmax.f32 %v2597_v29, 0.0  ;;  %v2323_v24 = vadd.f32 %v2275_v15, %v2127_v0  ;;  %v2543_v29 = vpop.permute.xlu1 %2542 }
 0x309   :  { %v2662_v47 = vsel %vm2642_vm0, %v2387_v46, %v2627_v20  ;;  %v2358_v52 = vadd.f32 %v3990_v51, %v2323_v24 }
 0x30a   :  { %2692 = vst [vmem:[#allocation6 + $0x88] sm:$0xff] %v2662_v47 }
 0x30b   :  { %v2388_v34 = vmul.f32 %v2358_v52, %v3802_v41  ;;  %v1999_v14 = vpop.f32.mrf.mxu2 }
 0x30c   :  { %v2128_v8 = vpop.f32.mrf.mxu3 }
 0x30d   :  { %v2598_v48 = vmul.f32 %v2523_v17, %v2388_v34  ;;  %v2129_v26 = vadd.f32 %v2128_v8, %v1996_v61  ;;  %v2548_v8 = vpop.permute.xlu2 %2547 }
 0x30e   :  { %v2277_v55 = vpop.f32.mrf.mxu0 }
 0x30f   :  { %v2628_v22 = vmax.f32 %v2598_v48, 0.0  ;;  %v2324_v19 = vadd.f32 %v2277_v55, %v2129_v26 }
 0x311   :  { %v2663_v36 = vsel %vm2642_vm0, %v2388_v34, %v2628_v22  ;;  %v2359_v2 = vadd.f32 %v3990_v51, %v2324_v19 }
 0x312   :  { %2693 = vst [vmem:[#allocation6 + $0x90] sm:$0xff] %v2663_v36 }
 0x313   :  { %v2389_v59 = vmul.f32 %v2359_v2, %v3809_v57  ;;  %v2001_v1 = vpop.f32.mrf.mxu2 }
 0x314   :  { %v2131_v49 = vpop.f32.mrf.mxu3 }
 0x315   :  { %v2599_v16 = vmul.f32 %v2528_v60, %v2389_v59  ;;  %v2132_v41 = vadd.f32 %v2131_v49, %v1999_v14  ;;  %v2553_v60 = vpop.permute.xlu0 %2552 }
 0x316   :  { %v2280_v63 = vpop.f32.mrf.mxu0 }
 0x317   :  { %v2629_v5 = vmax.f32 %v2599_v16, 0.0  ;;  %v2325_v32 = vadd.f32 %v2280_v63, %v2132_v41 }
 0x319   :  { %v2664_v53 = vsel %vm2642_vm0, %v2389_v59, %v2629_v5  ;;  %v2360_v37 = vadd.f32 %v3990_v51, %v2325_v32 }
 0x31a   :  { %2694 = vst [vmem:[#allocation6 + $0x98] sm:$0xff] %v2664_v53 }
 0x31b   :  { %v2390_v18 = vmul.f32 %v2360_v37, %v3816_v35  ;;  %v2004_v58 = vpop.f32.mrf.mxu2 }
 0x31c   :  { %v2133_v56 = vpop.f32.mrf.mxu3 }
 0x31d   :  { %v2600_v21 = vmul.f32 %v2533_v33, %v2390_v18  ;;  %v2134_v57 = vadd.f32 %v2133_v56, %v2001_v1 }
 0x31e   :  { %v2282_v23 = vpop.f32.mrf.mxu0 }
 0x31f   :  { %v2630_v40 = vmax.f32 %v2600_v21, 0.0  ;;  %v2326_v45 = vadd.f32 %v2282_v23, %v2134_v57 }
 0x321   :  { %v2665_v10 = vsel %vm2642_vm0, %v2390_v18, %v2630_v40  ;;  %v2361_v62 = vadd.f32 %v3990_v51, %v2326_v45  ;;  %v2558_v18 = vpop.permute.xlu1 %2557 }
 0x322   :  { %2695 = vst [vmem:[#allocation6 + $0xa0] sm:$0xff] %v2665_v10 }
 0x323   :  { %v2391_v28 = vmul.f32 %v2361_v62, %v3823_v7  ;;  %v2006_v30 = vpop.f32.mrf.mxu2  ;;  %v2563_v62 = vpop.permute.xlu2 %2562 }
 0x324   :  { %v2136_v27 = vpop.f32.mrf.mxu3 }
 0x325   :  { %v2601_v13 = vmul.f32 %v2538_v54, %v2391_v28  ;;  %v2137_v35 = vadd.f32 %v2136_v27, %v2004_v58 }
 0x326   :  { %v2285_v42 = vpop.f32.mrf.mxu0 }
 0x327   :  { %v2631_v39 = vmax.f32 %v2601_v13, 0.0  ;;  %v2327_v4 = vadd.f32 %v2285_v42, %v2137_v35 }
 0x329   :  { %v2666_v46 = vsel %vm2642_vm0, %v2391_v28, %v2631_v39  ;;  %v2362_v43 = vadd.f32 %v3990_v51, %v2327_v4 }
 0x32a   :  { %2696 = vst [vmem:[#allocation6 + $0xa8] sm:$0xff] %v2666_v46  ;;  %v2568_v46 = vpop.permute.xlu0 %2567 }
 0x32b   :  { %v2392_v38 = vmul.f32 %v2362_v43, %v3830_v31  ;;  %v2009_v15 = vpop.f32.mrf.mxu2 }
 0x32c   :  { %v2138_v0 = vpop.f32.mrf.mxu3 }
 0x32d   :  { %v2602_v61 = vmul.f32 %v2543_v29, %v2392_v38  ;;  %v2139_v7 = vadd.f32 %v2138_v0, %v2006_v30 }
 0x32e   :  { %v2287_v20 = vpop.f32.mrf.mxu0 }
 0x32f   :  { %v2632_v24 = vmax.f32 %v2602_v61, 0.0  ;;  %v2328_v47 = vadd.f32 %v2287_v20, %v2139_v7  ;;  %v2573_v20 = vpop.permute.xlu1 %2572 }
 0x331   :  { %v2667_v52 = vsel %vm2642_vm0, %v2392_v38, %v2632_v24  ;;  %v2363_v34 = vadd.f32 %v3990_v51, %v2328_v47 }
 0x332   :  { %2697 = vst [vmem:[#allocation6 + $0xb0] sm:$0xff] %v2667_v52 }
 0x333   :  { %v2393_v17 = vmul.f32 %v2363_v34, %v3837_v11  ;;  %v2011_v14 = vpop.f32.mrf.mxu2 }
 0x334   :  { %v2141_v48 = vpop.f32.mrf.mxu3 }
 0x335   :  { %v2603_v26 = vmul.f32 %v2548_v8, %v2393_v17  ;;  %v2142_v31 = vadd.f32 %v2141_v48, %v2009_v15 }
 0x336   :  { %v2290_v55 = vpop.f32.mrf.mxu0 }
 0x337   :  { %v2633_v22 = vmax.f32 %v2603_v26, 0.0  ;;  %v2329_v19 = vadd.f32 %v2290_v55, %v2142_v31  ;;  %v2578_v55 = vpop.permute.xlu2 %2577 }
 0x339   :  { %v2668_v36 = vsel %vm2642_vm0, %v2393_v17, %v2633_v22  ;;  %v2364_v2 = vadd.f32 %v3990_v51, %v2329_v19 }
 0x33a   :  { %2698 = vst [vmem:[#allocation6 + $0xb8] sm:$0xff] %v2668_v36 }
 0x33b   :  { %v2394_v59 = vmul.f32 %v2364_v2, %v3844_v50  ;;  %v2014_v1 = vpop.f32.mrf.mxu2 }
 0x33c   :  { %v2143_v49 = vpop.f32.mrf.mxu3 }
 0x33d   :  { %v2604_v16 = vmul.f32 %v2553_v60, %v2394_v59  ;;  %v2144_v11 = vadd.f32 %v2143_v49, %v2011_v14 }
 0x33e   :  { %v2292_v41 = vpop.f32.mrf.mxu0 }
 0x33f   :  { %v2634_v63 = vmax.f32 %v2604_v16, 0.0  ;;  %v2330_v5 = vadd.f32 %v2292_v41, %v2144_v11 }
 0x341   :  { %v2669_v32 = vsel %vm2642_vm0, %v2394_v59, %v2634_v63  ;;  %v2365_v53 = vadd.f32 %v3990_v51, %v2330_v5 }
 0x342   :  { %2699 = vst [vmem:[#allocation6 + $0xc0] sm:$0xff] %v2669_v32 }
 0x343   :  { %v2395_v37 = vmul.f32 %v2365_v53, %v3851_v6  ;;  %v2016_v23 = vpop.f32.mrf.mxu2 }
 0x344   :  { %v2146_v33 = vpop.f32.mrf.mxu3 }
 0x345   :  { %v2605_v56 = vmul.f32 %v2558_v18, %v2395_v37  ;;  %v2147_v50 = vadd.f32 %v2146_v33, %v2014_v1 }
 0x346   :  { %v2295_v21 = vpop.f32.mrf.mxu0 }
 0x347   :  { %v2635_v57 = vmax.f32 %v2605_v56, 0.0  ;;  %v2331_v58 = vadd.f32 %v2295_v21, %v2147_v50 }
 0x349   :  { %v2670_v40 = vsel %vm2642_vm0, %v2395_v37, %v2635_v57  ;;  %v2366_v45 = vadd.f32 %v3990_v51, %v2331_v58 }
 0x34a   :  { %2700 = vst [vmem:[#allocation6 + $0xc8] sm:$0xff] %v2670_v40 }
 0x34b   :  { %v2396_v10 = vmul.f32 %v2366_v45, %v3858_v3  ;;  %v2019_v39 = vpop.f32.mrf.mxu2 }
 0x34c   :  { %v2148_v28 = vpop.f32.mrf.mxu3 }
 0x34d   :  { %v2606_v54 = vmul.f32 %v2563_v62, %v2396_v10  ;;  %v2149_v6 = vadd.f32 %v2148_v28, %v2016_v23 }
 0x34e   :  { %v2297_v27 = vpop.f32.mrf.mxu0 }
 0x34f   :  { %v2636_v13 = vmax.f32 %v2606_v54, 0.0  ;;  %v2332_v35 = vadd.f32 %v2297_v27, %v2149_v6 }
 0x351   :  { %v2671_v30 = vsel %vm2642_vm0, %v2396_v10, %v2636_v13  ;;  %v2367_v42 = vadd.f32 %v3990_v51, %v2332_v35 }
 0x352   :  { %2701 = vst [vmem:[#allocation6 + $0xd0] sm:$0xff] %v2671_v30 }
 0x353   :  { %v2397_v4 = vmul.f32 %v2367_v42, %v3865_v9  ;;  %v2021_v47 = vpop.f32.mrf.mxu2 }
 0x354   :  { %v2151_v43 = vpop.f32.mrf.mxu3 }
 0x355   :  { %v2607_v38 = vmul.f32 %v2568_v46, %v2397_v4  ;;  %v2152_v3 = vadd.f32 %v2151_v43, %v2019_v39 }
 0x356   :  { %v2300_v29 = vpop.f32.mrf.mxu0 }
 0x357   :  { %v2637_v0 = vmax.f32 %v2607_v38, 0.0  ;;  %v2333_v61 = vadd.f32 %v2300_v29, %v2152_v3 }
 0x359   :  { %v2672_v7 = vsel %vm2642_vm0, %v2397_v4, %v2637_v0  ;;  %v2368_v15 = vadd.f32 %v3990_v51, %v2333_v61 }
 0x35a   :  { %2702 = vst [vmem:[#allocation6 + $0xd8] sm:$0xff] %v2672_v7 }
 0x35b   :  { %v2398_v24 = vmul.f32 %v2368_v15, %v3872_v44 }
 0x35c   :  { %v2153_v52 = vpop.f32.mrf.mxu3 }
 0x35d   :  { %v2608_v34 = vmul.f32 %v2573_v20, %v2398_v24  ;;  %v2154_v9 = vadd.f32 %v2153_v52, %v2021_v47 }
 0x35e   :  { %v2302_v17 = vpop.f32.mrf.mxu0 }
 0x35f   :  { %v2638_v8 = vmax.f32 %v2608_v34, 0.0  ;;  %v2334_v48 = vadd.f32 %v2302_v17, %v2154_v9 }
 0x361   :  { %v2673_v26 = vsel %vm2642_vm0, %v2398_v24, %v2638_v8  ;;  %v2369_v31 = vadd.f32 %v3990_v51, %v2334_v48 }
 0x362   :  { %2703 = vst [vmem:[#allocation6 + $0xe0] sm:$0xff] %v2673_v26 }
 0x363   :  { %v2399_v14 = vmul.f32 %v2369_v31, %v3887_v25 }
 0x365   :  { %v2609_v44 = vmul.f32 %v2578_v55, %v2399_v14 }
 0x367   :  { %v2639_v22 = vmax.f32 %v2609_v44, 0.0 }
 0x369   :  { %v2674_v19 = vsel %vm2642_vm0, %v2399_v14, %v2639_v22 }
 0x36a   :  { %2704 = vst [vmem:[#allocation6 + $0xe8] sm:$0xff] %v2674_v19 }
 0x36b   :  { %2717 = dma.vmem_to_hbm [thread:$0]  %s2710_s10, 3840, %s2712_s13, [#allocation5], %s3184_s14, %s3184_s14, %s3185_s15  }
 0x36c   :  { %3176 = dma.done.wait [#allocation5], 3840  }
 0x36d   :  { %3177 = vsyncadd [#allocation5], 4294963456 }
 0x36e   :  { %2722 = vsyncpa [#allocation4], 1 }
 0x36f   :  { %2723 = vsyncpa [#allocation5], 1 }

</bundles_post_ra>
